<compile_context>
chip_gen: v6e
topology: v6e:2x2x1
jax: 0.10.0
libtpu: 0.0.40
codegen_flags: <defaults>
</compile_context>

<pallas_src>
import numpy as np
import jax
import jax.numpy as jnp
from jax import lax
from jax.experimental import pallas as pl
from jax.experimental.pallas import tpu as pltpu

EPS = 1e-8          # WF eps
BN_EPS = 1e-5       # nn.BatchNorm2d default eps


# ------------------------------------------------------------------ helpers --
def _bilinear_upsample_matrix_1d(n):
    """(2n, n) matrix == PyTorch F.interpolate(scale=2, 'bilinear', align_corners=False)."""
    U = np.zeros((2 * n, n), np.float32)
    for i in range(2 * n):
        src = (i + 0.5) / 2.0 - 0.5
        if src < 0.0:
            src = 0.0                      # PyTorch clamps negative source coords to 0
        lo = int(np.floor(src))
        hi = min(lo + 1, n - 1)
        w = src - lo
        U[i, lo] += 1.0 - w
        U[i, hi] += w
    return U


# ------------------------------------------------------------------ wrapper --
def wf_forward(x_nchw, res_nchw, params):
    B, Cd, H, W = x_nchw.shape
    _, Cin, H2, W2 = res_nchw.shape
    assert H2 == 2 * H and W2 == 2 * W
    N = H2 * W2

    def kernel(fw_ref, x_ref, res_ref, uw_ref, wpre_ref, wpost_ref,
               bnb_ref, out_ref, pad_ref):
        # fuse weights: relu + normalize (pure scalar work from SMEM)
        w0 = jnp.maximum(fw_ref[0], 0.0)
        w1 = jnp.maximum(fw_ref[1], 0.0)
        inv = 1.0 / (w0 + w1 + EPS)
        f0 = w0 * inv
        f1 = w1 * inv

        x = x_ref[0]                                   # (H,  W,  Cd)
        res = res_ref[0]                               # (H2, W2, Cin)

        # ---- bilinear 2x upsample, separable (fw[1] folded into the matrix) --
        # W direction: batched (2W, W) x (W, Cd) matmuls on the MXU.
        uw_s = uw_ref[...] * f1                                    # (W2, W), tiny
        uw_b = jnp.broadcast_to(uw_s, (H, W2, W))
        xw = jnp.einsum('hvw,hwc->hvc', uw_b, x,
                        preferred_element_type=jnp.float32)        # (H, W2, Cd)
        # H direction: fixed 0.25/0.75 blends on the VPU (leading-dim shifts),
        # interleave even/odd rows via a leading-dims-only reshape (free).
        top = jnp.concatenate([xw[:1], xw[:-1]], axis=0)           # clamped h-1
        bot = jnp.concatenate([xw[1:], xw[-1:]], axis=0)           # clamped h+1
        even = 0.25 * top + 0.75 * xw
        odd = 0.75 * xw + 0.25 * bot
        xup = jnp.concatenate(
            [even.reshape(H, 1, W2, Cd), odd.reshape(H, 1, W2, Cd)],
            axis=1).reshape(H2, W2, Cd)                            # = f1 * upsample(x)

        # ---- 1x1 conv on res (channel matmul, fw[0] folded into the weight) --
        wpre_s = wpre_ref[...] * f0                                # (Cin, Cd), tiny
        pre = jnp.dot(res.reshape(N, Cin), wpre_s,
                      preferred_element_type=jnp.float32).reshape(H2, W2, Cd)
        fused = pre + xup                                          # (H2, W2, Cd)

        # ---- 3x3 conv (padding=1): padded scratch + one im2col matmul --------
        pad_ref[...] = jnp.zeros(pad_ref.shape, jnp.float32)
        pad_ref[pl.ds(1, H2), pl.ds(1, W2), :] = fused
        taps = [pad_ref[pl.ds(kh, H2), pl.ds(kw, W2), :]
                for kh in range(3) for kw in range(3)]
        slab = jnp.concatenate(taps, axis=-1).reshape(N, 9 * Cd)   # (N, 9*Cd)
        conv = jnp.dot(slab, wpost_ref[...],                       # BN scale pre-folded
                       preferred_element_type=jnp.float32)         # (N, Cd)

        # ---- folded BN bias + ReLU6, lane-dense (Cd, N) store -----------------
        y = conv.T + bnb_ref[...]                                  # (Cd, N)
        out_ref[0] = jnp.minimum(jnp.maximum(y, 0.0), 6.0)

    # wrapper-side constant folding / layout plumbing (plain JAX, cheap)
    x = jnp.transpose(x_nchw, (0, 2, 3, 1))          # (B, H,  W,  Cd)
    res = jnp.transpose(res_nchw, (0, 2, 3, 1))      # (B, H2, W2, Cin)
    uw = jnp.asarray(_bilinear_upsample_matrix_1d(W))              # (2W, W)
    w_post_folded = params['w_post'] * params['bn_scale'][None, :]  # (9Cd, Cd)
    bn_bias = params['bn_bias'].reshape(Cd, 1)

    out = pl.pallas_call(
        kernel,
        out_shape=jax.ShapeDtypeStruct((B, Cd, N), jnp.float32),
        grid=(B,),
        in_specs=[
            pl.BlockSpec(memory_space=pltpu.MemorySpace.SMEM),      # fuse weights (2,)
            pl.BlockSpec((1, H, W, Cd), lambda b: (b, 0, 0, 0)),    # x (low-res feat)
            pl.BlockSpec((1, H2, W2, Cin), lambda b: (b, 0, 0, 0)),  # res (skip feat)
            pl.BlockSpec((W2, W), lambda b: (0, 0)),                # 1-D upsample matrix
            pl.BlockSpec((Cin, Cd), lambda b: (0, 0)),              # 1x1 conv weight
            pl.BlockSpec((9 * Cd, Cd), lambda b: (0, 0)),           # im2col 3x3 * BN scale
            pl.BlockSpec((Cd, 1), lambda b: (0, 0)),                # folded BN bias
        ],
        out_specs=pl.BlockSpec((1, Cd, N), lambda b: (b, 0, 0)),
        scratch_shapes=[pltpu.VMEM((H2 + 2, W2 + 2, Cd), jnp.float32)],
        compiler_params=pltpu.CompilerParams(
            dimension_semantics=("parallel",),
            vmem_limit_bytes=48 * 1024 * 1024),                     # legal on v7x (64 MiB)
    )(params['fuse_w'], x, res, uw, params['w_pre'], w_post_folded, bn_bias)

    # (B, Cd, H2*W2) is already NCHW up to the trailing reshape.
    return out.reshape(B, Cd, H2, W2)


# ------------------------------------------------------------------- params --
def init_params(key, in_channels, decode_channels):
    k1, k2, k3, k4, k5, k6 = jax.random.split(key, 6)
    w_pre = 0.1 * jax.random.normal(k1, (in_channels, decode_channels), jnp.float32)
    w_post_hwio = 0.1 * jax.random.normal(
        k2, (3, 3, decode_channels, decode_channels), jnp.float32)
    gamma = 1.0 + 0.1 * jax.random.normal(k3, (decode_channels,), jnp.float32)
    beta = 0.1 * jax.random.normal(k4, (decode_channels,), jnp.float32)
    running_mean = 0.1 * jax.random.normal(k5, (decode_channels,), jnp.float32)
    running_var = jax.random.uniform(k6, (decode_channels,), jnp.float32, 0.5, 1.5)
    bn_scale = gamma / jnp.sqrt(running_var + BN_EPS)
    bn_bias = beta - running_mean * bn_scale
    return {
        'w_pre': w_pre,                                            # (Cin, Cd)
        'w_post_hwio': w_post_hwio,                                # (3,3,Cd,Cd)
        'w_post': w_post_hwio.reshape(9 * decode_channels, decode_channels),
        'bn_scale': bn_scale,
        'bn_bias': bn_bias,
        'fuse_w': jnp.ones((2,), jnp.float32),   # matches nn.Parameter(torch.ones(2))
    }


# --------------------------------------------------------------- reference --
def wf_reference(x_nchw, res_nchw, params):
    B, Cd, H, W = x_nchw.shape
    x = jnp.transpose(x_nchw, (0, 2, 3, 1))
    res = jnp.transpose(res_nchw, (0, 2, 3, 1))
    xup = jax.image.resize(x, (B, 2 * H, 2 * W, Cd), method='bilinear')
    w = jnp.maximum(params['fuse_w'], 0.0)
    fw = w / (jnp.sum(w) + EPS)
    pre = jnp.einsum('bhwc,cd->bhwd', res, params['w_pre'],
                     precision=lax.Precision.HIGHEST)
    fused = fw[0] * pre + fw[1] * xup
    conv = lax.conv_general_dilated(
        fused, params['w_post_hwio'], (1, 1), 'SAME',
        dimension_numbers=('NHWC', 'HWIO', 'NHWC'),
        precision=lax.Precision.HIGHEST)
    y = conv * params['bn_scale'] + params['bn_bias']
    y = jnp.clip(y, 0.0, 6.0)
    return jnp.transpose(y, (0, 3, 1, 2))


# ------------------------------------------------------------------- main ----
if __name__ == "__main__":
    B, Cin, Cd, H, W = 2, 8, 16, 8, 8
    key = jax.random.PRNGKey(0)
    kx, kr, kp = jax.random.split(key, 3)
    x = jax.random.normal(kx, (B, Cd, H, W), jnp.float32)             # decoder feat (NCHW)
    res = jax.random.normal(kr, (B, Cin, 2 * H, 2 * W), jnp.float32)  # skip feat (NCHW)
    params = init_params(kp, Cin, Cd)

    out = wf_forward(x, res, params)
    out = jax.block_until_ready(out)
    assert out.shape == (B, Cd, 2 * H, 2 * W)

    ref = wf_reference(x, res, params)
    np.testing.assert_allclose(np.asarray(out), np.asarray(ref), rtol=2e-3, atol=2e-3)
    print("KERNEL_OK")
</pallas_src>

<mosaic_0001>
module attributes {stable_mosaic.version = 11 : i64} {
  func.func @kernel(%arg0: i32, %arg1: memref<2xf32, #tpu.memory_space<smem>>, %arg2: memref<1x8x8x16xf32, #tpu.memory_space<vmem>>, %arg3: memref<1x16x16x8xf32, #tpu.memory_space<vmem>>, %arg4: memref<16x8xf32, #tpu.memory_space<vmem>>, %arg5: memref<8x16xf32, #tpu.memory_space<vmem>>, %arg6: memref<144x16xf32, #tpu.memory_space<vmem>>, %arg7: memref<16x1xf32, #tpu.memory_space<vmem>>, %arg8: memref<1x16x256xf32, #tpu.memory_space<vmem>>, %arg9: memref<18x18x16xf32, #tpu.memory_space<vmem>>) attributes {dimension_semantics = [#tpu.dimension_semantics<parallel>], iteration_bounds = array<i64: 2>, scalar_prefetch = 0 : i64, scratch_operands = 1 : i64, tpu.core_type = #tpu.core_type<tc>, window_params = [{transform_indices = @transform_0, window_bounds = array<i64: 2>}, {transform_indices = @transform_1, window_bounds = array<i64: 1, 8, 8, 16>}, {transform_indices = @transform_2, window_bounds = array<i64: 1, 16, 16, 8>}, {pipeline_mode = #tpu.pipeline_mode<synchronous>, transform_indices = @transform_3, window_bounds = array<i64: 16, 8>}, {pipeline_mode = #tpu.pipeline_mode<synchronous>, transform_indices = @transform_4, window_bounds = array<i64: 8, 16>}, {pipeline_mode = #tpu.pipeline_mode<synchronous>, transform_indices = @transform_5, window_bounds = array<i64: 144, 16>}, {pipeline_mode = #tpu.pipeline_mode<synchronous>, transform_indices = @transform_6, window_bounds = array<i64: 16, 1>}, {transform_indices = @transform_7, window_bounds = array<i64: 1, 16, 256>}]} {
    %c0 = arith.constant 0 : index
    %0 = memref.load %arg1[%c0] : memref<2xf32, #tpu.memory_space<smem>>
    %cst = arith.constant 0.000000e+00 : f32
    %1 = arith.maximumf %0, %cst : f32
    %c1 = arith.constant 1 : index
    %2 = memref.load %arg1[%c1] : memref<2xf32, #tpu.memory_space<smem>>
    %cst_0 = arith.constant 0.000000e+00 : f32
    %3 = arith.maximumf %2, %cst_0 : f32
    %4 = arith.addf %1, %3 : f32
    %cst_1 = arith.constant 9.99999993E-9 : f32
    %5 = arith.addf %4, %cst_1 : f32
    %cst_2 = arith.constant 1.000000e+00 : f32
    %6 = arith.divf %cst_2, %5 : f32
    %7 = arith.mulf %1, %6 : f32
    %8 = arith.mulf %3, %6 : f32
    %c0_3 = arith.constant 0 : index
    %c0_4 = arith.constant 0 : index
    %c0_5 = arith.constant 0 : index
    %c0_6 = arith.constant 0 : index
    %9 = vector.load %arg2[%c0_3, %c0_4, %c0_5, %c0_6] : memref<1x8x8x16xf32, #tpu.memory_space<vmem>>, vector<1x8x8x16xf32>
    %10 = vector.shape_cast %9 : vector<1x8x8x16xf32> to vector<8x8x16xf32>
    %c0_7 = arith.constant 0 : index
    %c0_8 = arith.constant 0 : index
    %c0_9 = arith.constant 0 : index
    %c0_10 = arith.constant 0 : index
    %11 = vector.load %arg3[%c0_7, %c0_8, %c0_9, %c0_10] : memref<1x16x16x8xf32, #tpu.memory_space<vmem>>, vector<1x16x16x8xf32>
    %12 = vector.shape_cast %11 : vector<1x16x16x8xf32> to vector<16x16x8xf32>
    %c0_11 = arith.constant 0 : index
    %c0_12 = arith.constant 0 : index
    %13 = vector.load %arg4[%c0_11, %c0_12] : memref<16x8xf32, #tpu.memory_space<vmem>>, vector<16x8xf32>
    %14 = vector.broadcast %8 : f32 to vector<16x8xf32>
    %15 = arith.mulf %13, %14 : vector<16x8xf32>
    %16 = vector.shape_cast %15 : vector<16x8xf32> to vector<1x16x8xf32>
    %17 = vector.broadcast %16 : vector<1x16x8xf32> to vector<8x16x8xf32>
    "tpu.trace_start"() <{level = 10 : i32, message = "hvw,hwc->hvc"}> : () -> ()
    %cst_13 = arith.constant dense<0.000000e+00> : vector<8x16x16xf32>
    %18 = tpu.matmul %17, %10, %cst_13 {dimension_numbers = #tpu.dot_dimension_numbers<[2], [1], [1], [2], [0, 0, 0, 1, 1, 2], [0], [0]>} : vector<8x16x8xf32>, vector<8x8x16xf32>, vector<8x16x16xf32> -> vector<8x16x16xf32>
    "tpu.trace_stop"() : () -> ()
    %19 = vector.extract_strided_slice %18 {offsets = [0, 0, 0], sizes = [1, 16, 16], strides = [1, 1, 1]} : vector<8x16x16xf32> to vector<1x16x16xf32>
    %20 = vector.extract_strided_slice %18 {offsets = [0, 0, 0], sizes = [7, 16, 16], strides = [1, 1, 1]} : vector<8x16x16xf32> to vector<7x16x16xf32>
    %21 = tpu.concatenate %19, %20 in 0 : vector<1x16x16xf32>, vector<7x16x16xf32> -> vector<8x16x16xf32>
    %22 = vector.extract_strided_slice %18 {offsets = [1, 0, 0], sizes = [7, 16, 16], strides = [1, 1, 1]} : vector<8x16x16xf32> to vector<7x16x16xf32>
    %23 = vector.extract_strided_slice %18 {offsets = [7, 0, 0], sizes = [1, 16, 16], strides = [1, 1, 1]} : vector<8x16x16xf32> to vector<1x16x16xf32>
    %24 = tpu.concatenate %22, %23 in 0 : vector<7x16x16xf32>, vector<1x16x16xf32> -> vector<8x16x16xf32>
    %cst_14 = arith.constant 2.500000e-01 : f32
    %25 = vector.broadcast %cst_14 : f32 to vector<8x16x16xf32>
    %26 = arith.mulf %25, %21 : vector<8x16x16xf32>
    %cst_15 = arith.constant 7.500000e-01 : f32
    %27 = vector.broadcast %cst_15 : f32 to vector<8x16x16xf32>
    %28 = arith.mulf %27, %18 : vector<8x16x16xf32>
    %29 = arith.addf %26, %28 : vector<8x16x16xf32>
    %cst_16 = arith.constant 7.500000e-01 : f32
    %30 = vector.broadcast %cst_16 : f32 to vector<8x16x16xf32>
    %31 = arith.mulf %30, %18 : vector<8x16x16xf32>
    %cst_17 = arith.constant 2.500000e-01 : f32
    %32 = vector.broadcast %cst_17 : f32 to vector<8x16x16xf32>
    %33 = arith.mulf %32, %24 : vector<8x16x16xf32>
    %34 = arith.addf %31, %33 : vector<8x16x16xf32>
    %35 = vector.shape_cast %29 : vector<8x16x16xf32> to vector<8x1x16x16xf32>
    %36 = vector.shape_cast %34 : vector<8x16x16xf32> to vector<8x1x16x16xf32>
    %37 = tpu.concatenate %35, %36 in 1 : vector<8x1x16x16xf32>, vector<8x1x16x16xf32> -> vector<8x2x16x16xf32>
    %38 = vector.shape_cast %37 : vector<8x2x16x16xf32> to vector<16x16x16xf32>
    %c0_18 = arith.constant 0 : index
    %c0_19 = arith.constant 0 : index
    %39 = vector.load %arg5[%c0_18, %c0_19] : memref<8x16xf32, #tpu.memory_space<vmem>>, vector<8x16xf32>
    %40 = vector.broadcast %7 : f32 to vector<8x16xf32>
    %41 = arith.mulf %39, %40 : vector<8x16xf32>
    %42 = vector.shape_cast %12 : vector<16x16x8xf32> to vector<256x8xf32>
    %cst_20 = arith.constant dense<0.000000e+00> : vector<256x16xf32>
    %43 = tpu.matmul %42, %41, %cst_20 {dimension_numbers = #tpu.dot_dimension_numbers<[1], [0], [0], [1], [0, 0, 1, 1], [], []>} : vector<256x8xf32>, vector<8x16xf32>, vector<256x16xf32> -> vector<256x16xf32>
    %44 = vector.shape_cast %43 : vector<256x16xf32> to vector<16x16x16xf32>
    %45 = arith.addf %44, %38 : vector<16x16x16xf32>
    %cst_21 = arith.constant 0.000000e+00 : f32
    %46 = vector.broadcast %cst_21 : f32 to vector<18x18x16xf32>
    %c0_22 = arith.constant 0 : index
    %c0_23 = arith.constant 0 : index
    %c0_24 = arith.constant 0 : index
    %47 = vector.load %arg9[%c0_22, %c0_23, %c0_24] : memref<18x18x16xf32, #tpu.memory_space<vmem>>, vector<18x18x16xf32>
    tpu.vector_store %arg9[%c0_22, %c0_23, %c0_24], %46 {strides = array<i32>} : memref<18x18x16xf32, #tpu.memory_space<vmem>>, vector<18x18x16xf32>,
    %c1_25 = arith.constant 1 : index
    %c1_26 = arith.constant 1 : index
    %c0_27 = arith.constant 0 : index
    %48 = vector.load %arg9[%c1_25, %c1_26, %c0_27] : memref<18x18x16xf32, #tpu.memory_space<vmem>>, vector<16x16x16xf32>
    tpu.vector_store %arg9[%c1_25, %c1_26, %c0_27], %45 {strides = array<i32>} : memref<18x18x16xf32, #tpu.memory_space<vmem>>, vector<16x16x16xf32>,
    %c0_28 = arith.constant 0 : index
    %c0_29 = arith.constant 0 : index
    %c0_30 = arith.constant 0 : index
    %49 = vector.load %arg9[%c0_28, %c0_29, %c0_30] : memref<18x18x16xf32, #tpu.memory_space<vmem>>, vector<16x16x16xf32>
    %c0_31 = arith.constant 0 : index
    %c1_32 = arith.constant 1 : index
    %c0_33 = arith.constant 0 : index
    %50 = vector.load %arg9[%c0_31, %c1_32, %c0_33] : memref<18x18x16xf32, #tpu.memory_space<vmem>>, vector<16x16x16xf32>
    %c0_34 = arith.constant 0 : index
    %c2 = arith.constant 2 : index
    %c0_35 = arith.constant 0 : index
    %51 = vector.load %arg9[%c0_34, %c2, %c0_35] : memref<18x18x16xf32, #tpu.memory_space<vmem>>, vector<16x16x16xf32>
    %c1_36 = arith.constant 1 : index
    %c0_37 = arith.constant 0 : index
    %c0_38 = arith.constant 0 : index
    %52 = vector.load %arg9[%c1_36, %c0_37, %c0_38] : memref<18x18x16xf32, #tpu.memory_space<vmem>>, vector<16x16x16xf32>
    %c1_39 = arith.constant 1 : index
    %c1_40 = arith.constant 1 : index
    %c0_41 = arith.constant 0 : index
    %53 = vector.load %arg9[%c1_39, %c1_40, %c0_41] : memref<18x18x16xf32, #tpu.memory_space<vmem>>, vector<16x16x16xf32>
    %c1_42 = arith.constant 1 : index
    %c2_43 = arith.constant 2 : index
    %c0_44 = arith.constant 0 : index
    %54 = vector.load %arg9[%c1_42, %c2_43, %c0_44] : memref<18x18x16xf32, #tpu.memory_space<vmem>>, vector<16x16x16xf32>
    %c2_45 = arith.constant 2 : index
    %c0_46 = arith.constant 0 : index
    %c0_47 = arith.constant 0 : index
    %55 = vector.load %arg9[%c2_45, %c0_46, %c0_47] : memref<18x18x16xf32, #tpu.memory_space<vmem>>, vector<16x16x16xf32>
    %c2_48 = arith.constant 2 : index
    %c1_49 = arith.constant 1 : index
    %c0_50 = arith.constant 0 : index
    %56 = vector.load %arg9[%c2_48, %c1_49, %c0_50] : memref<18x18x16xf32, #tpu.memory_space<vmem>>, vector<16x16x16xf32>
    %c2_51 = arith.constant 2 : index
    %c2_52 = arith.constant 2 : index
    %c0_53 = arith.constant 0 : index
    %57 = vector.load %arg9[%c2_51, %c2_52, %c0_53] : memref<18x18x16xf32, #tpu.memory_space<vmem>>, vector<16x16x16xf32>
    %58 = tpu.concatenate %49, %50, %51, %52, %53, %54, %55, %56, %57 in 2 : vector<16x16x16xf32>, vector<16x16x16xf32>, vector<16x16x16xf32>, vector<16x16x16xf32>, vector<16x16x16xf32>, vector<16x16x16xf32>, vector<16x16x16xf32>, vector<16x16x16xf32>, vector<16x16x16xf32> -> vector<16x16x144xf32>
    %59 = vector.shape_cast %58 : vector<16x16x144xf32> to vector<256x144xf32>
    %c0_54 = arith.constant 0 : index
    %c0_55 = arith.constant 0 : index
    %60 = vector.load %arg6[%c0_54, %c0_55] : memref<144x16xf32, #tpu.memory_space<vmem>>, vector<144x16xf32>
    %cst_56 = arith.constant dense<0.000000e+00> : vector<256x16xf32>
    %61 = tpu.matmul %59, %60, %cst_56 {dimension_numbers = #tpu.dot_dimension_numbers<[1], [0], [0], [1], [0, 0, 1, 1], [], []>} : vector<256x144xf32>, vector<144x16xf32>, vector<256x16xf32> -> vector<256x16xf32>
    %62 = tpu.transpose %61, [1, 0] : vector<256x16xf32> -> vector<16x256xf32>
    %c0_57 = arith.constant 0 : index
    %c0_58 = arith.constant 0 : index
    %63 = vector.load %arg7[%c0_57, %c0_58] : memref<16x1xf32, #tpu.memory_space<vmem>>, vector<16x1xf32>
    %64 = vector.broadcast %63 : vector<16x1xf32> to vector<16x256xf32>
    %65 = arith.addf %62, %64 : vector<16x256xf32>
    %cst_59 = arith.constant 0.000000e+00 : f32
    %66 = vector.broadcast %cst_59 : f32 to vector<16x256xf32>
    %67 = arith.maximumf %65, %66 : vector<16x256xf32>
    %cst_60 = arith.constant 6.000000e+00 : f32
    %68 = vector.broadcast %cst_60 : f32 to vector<16x256xf32>
    %69 = arith.minimumf %67, %68 : vector<16x256xf32>
    %c0_61 = arith.constant 0 : index
    %c0_62 = arith.constant 0 : index
    %c0_63 = arith.constant 0 : index
    %70 = vector.load %arg8[%c0_61, %c0_62, %c0_63] : memref<1x16x256xf32, #tpu.memory_space<vmem>>, vector<1x16x256xf32>
    %71 = vector.shape_cast %70 : vector<1x16x256xf32> to vector<16x256xf32>
    %72 = vector.shape_cast %69 : vector<16x256xf32> to vector<1x16x256xf32>
    tpu.vector_store %arg8[%c0_61, %c0_62, %c0_63], %72 {strides = array<i32>} : memref<1x16x256xf32, #tpu.memory_space<vmem>>, vector<1x16x256xf32>,
    return
  }
  func.func @transform_0(%arg0: i32) -> i32 {
    %c0_i32 = arith.constant 0 : i32
    %c0_i32_0 = arith.constant 0 : i32
    return %c0_i32 : i32
  }
  func.func @transform_1(%arg0: i32) -> (i32, i32, i32, i32) {
    %c0_i32 = arith.constant 0 : i32
    %c0_i32_0 = arith.constant 0 : i32
    %c0_i32_1 = arith.constant 0 : i32
    %c0_i32_2 = arith.constant 0 : i32
    return %arg0, %c0_i32, %c0_i32_0, %c0_i32_1 : i32, i32, i32, i32
  }
  func.func @transform_2(%arg0: i32) -> (i32, i32, i32, i32) {
    %c0_i32 = arith.constant 0 : i32
    %c0_i32_0 = arith.constant 0 : i32
    %c0_i32_1 = arith.constant 0 : i32
    %c0_i32_2 = arith.constant 0 : i32
    return %arg0, %c0_i32, %c0_i32_0, %c0_i32_1 : i32, i32, i32, i32
  }
  func.func @transform_3(%arg0: i32) -> (i32, i32) {
    %c0_i32 = arith.constant 0 : i32
    %c0_i32_0 = arith.constant 0 : i32
    %c0_i32_1 = arith.constant 0 : i32
    return %c0_i32, %c0_i32_0 : i32, i32
  }
  func.func @transform_4(%arg0: i32) -> (i32, i32) {
    %c0_i32 = arith.constant 0 : i32
    %c0_i32_0 = arith.constant 0 : i32
    %c0_i32_1 = arith.constant 0 : i32
    return %c0_i32, %c0_i32_0 : i32, i32
  }
  func.func @transform_5(%arg0: i32) -> (i32, i32) {
    %c0_i32 = arith.constant 0 : i32
    %c0_i32_0 = arith.constant 0 : i32
    %c0_i32_1 = arith.constant 0 : i32
    return %c0_i32, %c0_i32_0 : i32, i32
  }
  func.func @transform_6(%arg0: i32) -> (i32, i32) {
    %c0_i32 = arith.constant 0 : i32
    %c0_i32_0 = arith.constant 0 : i32
    %c0_i32_1 = arith.constant 0 : i32
    return %c0_i32, %c0_i32_0 : i32, i32
  }
  func.func @transform_7(%arg0: i32) -> (i32, i32, i32) {
    %c0_i32 = arith.constant 0 : i32
    %c0_i32_0 = arith.constant 0 : i32
    %c0_i32_1 = arith.constant 0 : i32
    return %arg0, %c0_i32, %c0_i32_0 : i32, i32, i32
  }
}

</mosaic_0001>

<bundles_post_ra>
// kernel: tpu_custom_call.1
= control target key start
LH: loop header
LB: loop body
LE: loop exit
PB: predicated region body
PF: predicated region fallthrough
CT: control target
= control target key end

     0   :  { %12 = vsyncpa [#allocation5], 0  ;;  %s5850_s0 = inlined_call_operand.vmem [shape: f32[2], index: 0, kind: input, shape index: {}]   ;;  %s5851_s1 = inlined_call_operand.vmem [shape: f32[2,8,8,16], index: 1, kind: input, shape index: {}]   ;;  %s5852_s2 = inlined_call_operand.vmem [shape: f32[2,16,16,8], index: 2, kind: input, shape index: {}]   ;;  %s5853_s3 = inlined_call_operand.vmem [shape: f32[16,8], index: 3, kind: input, shape index: {}]   ;;  %s5854_s4 = inlined_call_operand.vmem [shape: f32[8,16], index: 4, kind: input, shape index: {}]   ;;  %s5855_s5 = inlined_call_operand.vmem [shape: f32[144,16], index: 5, kind: input, shape index: {}]   ;;  %s5856_s6 = inlined_call_operand.vmem [shape: f32[16,1], index: 6, kind: input, shape index: {}]   ;;  %s5857_s7 = inlined_call_operand.hbm [shape: f32[2,16,256], index: 7, kind: output, shape index: {}]  }
   0x1   :  { %13 = vsyncpa [#allocation4], 0 }
   0x2   :  { %15 = vsyncpa [#allocation4 + $0x1], 0  ;;  %s4472_s24 = smov 0   ;;  %s4474_s25 = smov 0  }
   0x3   :  { %s4476_s26 = smov 0   ;;  %s4478_s27 = smov 0  }
   0x4 LB: > { %s4493_s28 = sadd.s32 4294967295, %s4417_s27   ;;  %s3429_s29 = sadd.s32 4294967294, %s4417_s27   ;;  %s4417_s27 = sphi %s4478_s27, %s5864_s27   ;;  %s4413_s26 = sphi %s4476_s26, %s5863_s26   ;;  %s4409_s25 = sphi %s4474_s25, %s5862_s25   ;;  %s4405_s24 = sphi %s4472_s24, %s5861_s24  }
   0x5   : > { %s4497_s30 = sadd.s32 1, %s4417_s27   ;;  %s185_s8 = sadd.s32 1, %s4413_s26 }
   0x6   : > { %s182_s9 = ssub.s32 %s4417_s27, %s4497_s30  ;;  %p195_p0 = scmp.ne.s32.totalorder %s4413_s26, %s4409_s25 }
   0x7   : > { %p183_p1 = scmp.eq.s32.totalorder %s182_s9, 0  ;;  %p196_p2 = scmp.eq.s32.totalorder %s4493_s28, 1 }
   0x8   : > { %p201_p3 = scmp.ne.s32.totalorder %s4409_s25, %s4405_s24  ;;  %p202_p4 = scmp.eq.s32.totalorder %s3429_s29, 1 }
   0x9   : > { %s4508_s10 = scalar_select %p183_p1, %s4413_s26, %s185_s8  }
   0xa   : > { %p4510_p5 = por %p196_p2, %p195_p0  ;;  %p4514_p6 = por %p202_p4, %p201_p3 }
   0xb   : > { %p3430_p7 = scmp.ge.s32.totalorder %s4417_s27, 1  ;;  %p209_p8 = scmp.lt.s32.totalorder %s4417_s27, 3 }
   0xc   : > { %p3728_p9 = scmp.eq.s32.totalorder %s4493_s28, 0  ;;  %s222_s16 = sshll.u32 %s5850_s0, 4  ;;  %s223_s16 = int_to_ptr.vmem [resolvable:$true] %s222_s16 }
   0xd   : > { %p4521_p10 = pnand %p3430_p7, %p209_p8  ;;  %s4338_s17 = scalar_lea.vmem %s223_s16, 16 }
   0xe   : > { %p4339_p13 = scmp.ne.s32.totalorder %s223_s16, %s4338_s17  ;;  %p4346_p3 = scmp.lt.s32.totalorder %s223_s16, %s223_s16 }
   0xf   : > { %p3720_p11 = pneg %p4521_p10  ;;  %p4347_p4 = scmp.lt.s32.totalorder %s4338_s17, %s4338_s17 }
  0x11   : > { %p3721_p12 = pnand %p3728_p9, %p3720_p11  ;;  %p4348_p7 = por %p4347_p4, %p4346_p3 }
  0x13   : > { %p4340_p0 = pneg %p3721_p12 }
  0x15   : > { %p4341_p1 = pnand %p4340_p0, %p4339_p13 }
  0x17   : > { %p4342_p2 = pneg %p4341_p1 }
  0x19   : > { %p4349_p8 = pnand %p4348_p7, %p4342_p2 }
  0x1b   : > { %4352 = shalt.err (!%p4349_p8)
}
  0x1c   : > { %s4419_s18 = smov [#allocation3]   ;;  %263 = sbr.rel (%p4521_p10) target bundleno = 972 (0x3cc), region = 48 }
  0x1d   : > { %3723 = dma.vmem_to_smem (!%p3721_p12), %s223_s16, 16, %s4419_s18, [#allocation5]  }
  0x21   : > { %4396 = dma.done.wait (%p3728_p9), [#allocation5], 16  }
  0x22   : > { %4398 = vsyncadd (%p3728_p9), [#allocation5], 4294967280 }
  0x23   : > { %269 = sfence }
  0x24   : > { %s311_s19 = sld [smem:[#allocation3]]  ;;  %p301_p11 = scmp.lt.s32.totalorder %s4493_s28, 1  ;;  %v362_v6 = vld [vmem:[%s5853_s3] sm:$0xff]  ;;  %v363_v7 = vld [vmem:[%s5853_s3 + $0x8] sm:$0xff]  ;;  %vm367_vm0 = vcmask 64512   ;;  %vm1394_vm1 = vcmask 130048  }
  0x25   : > { %s3440_s20 = sld [smem:[#allocation3 + $0x1]]  ;;  %s4420_s23 = smov 0.0   ;;  %v1038_v15 = vld [vmem:[%s5854_s4] sm:$0xff]  ;;  %vm1397_vm2 = vcmask 123904   ;;  %v4421_v50 = vmov 0.0   ;;  %vm2700_vm3 = vcmask 261120  }
  0x26   : > { %s4540_s21 = scalar_select %p301_p11, %s4493_s28, 1  ;;  %1400 = vst.msk [vmem:[#allocation2 + $0x20] sm:$0xff] %vm1394_vm1, %v4421_v50  ;;  %1395 = vst.msk [vmem:[#allocation2] sm:$0xff] %vm1394_vm1, %v4421_v50  ;;  %vm2766_vm4 = vcmask 523264   ;;  %vm2733_vm5 = vcmask 392192   ;;  %vm2799_vm6 = vcmask 654336  }
  0x27   : > { %1401 = vst.msk [vmem:[#allocation2 + $0x28] sm:$0x3] %vm1397_vm2, %v4421_v50  ;;  %1398 = vst.msk [vmem:[#allocation2 + $0x10] sm:$0x3] %vm1397_vm2, %v4421_v50  ;;  %vm2832_vm7 = vcmask 785408   ;;  %vm2865_vm8 = vcmask 916480  }
  0x28   : > { %s3526_s22 = sshll.u32 %s4540_s21, 6  ;;  %s3527_s9 = sshll.u32 %s4540_s21, 8  ;;  %1396 = vst.msk [vmem:[#allocation2 + $0x8] sm:$0xff] %vm1394_vm1, %v4421_v50  ;;  %1399 = vst.msk [vmem:[#allocation2 + $0x18] sm:$0xff] %vm1394_vm1, %v4421_v50 }
  0x29   : > { %s4548_s13 = scalar_lea.vmem %s5851_s1, %s3526_s22  ;;  %s4583_s21 = scalar_lea.vmem %s5852_s2, %s3527_s9  ;;  %1402 = vst.msk [vmem:[#allocation2 + $0x30] sm:$0xff] %vm1394_vm1, %v4421_v50  ;;  %1403 = vst.msk [vmem:[#allocation2 + $0x38] sm:$0xff] %vm1394_vm1, %v4421_v50 }
  0x2a   : > { %s4543_s29 = smax.f32 %s4420_s23, %s311_s19  ;;  %v322_v0 = vld [vmem:[%s4548_s13] sm:$0xff]  ;;  %v323_v1 = vld [vmem:[%s4548_s13 + $0x8] sm:$0xff]  ;;  %v324_v2 = vld [vmem:[%s4548_s13 + $0x10] sm:$0xff]  ;;  %1404 = vst.msk [vmem:[#allocation2 + $0x40] sm:$0x3] %vm1397_vm2, %v4421_v50  ;;  %s4425_s19 = smov 48  }
  0x2b   : > { %s314_s14 = smax.f32 %s4420_s23, %s3440_s20  ;;  %3586 = vmatprep.subr.mxu0 %v322_v0  ;;  %3591 = vmatprep.subr.mxu1 %v323_v1  ;;  %v325_v3 = vld [vmem:[%s4548_s13 + $0x18] sm:$0xff]  ;;  %v326_v11 = vld [vmem:[%s4548_s13 + $0x20] sm:$0xff]  ;;  %v327_v12 = vld [vmem:[%s4548_s13 + $0x28] sm:$0xff]  ;;  %1405 = vst.msk [vmem:[#allocation2 + $0x48] sm:$0xff] %vm1394_vm1, %v4421_v50  ;;  %s4426_s9 = smov 80  }
  0x2c   : > { %s315_s15 = sadd.f32 %s314_s14, %s4543_s29  ;;  %3587 = vmatpush3.msra.mxu0 %v322_v0  ;;  %3592 = vmatpush3.msra.mxu1 %v323_v1  ;;  %v328_v13 = vld [vmem:[%s4548_s13 + $0x30] sm:$0xff]  ;;  %v329_v14 = vld [vmem:[%s4548_s13 + $0x38] sm:$0xff]  ;;  %v330_v18 = vld [vmem:[%s4583_s21] sm:$0xff]  ;;  %1406 = vst.msk [vmem:[#allocation2 + $0x50] sm:$0xff] %vm1394_vm1, %v4421_v50  ;;  %s4422_s13 = smov 16  }
  0x2d   : > { %3596 = vmatprep.subr.mxu0 %v324_v2  ;;  %3601 = vmatprep.subr.mxu1 %v325_v3  ;;  %v331_v19 = vld [vmem:[%s4583_s21 + $0x8] sm:$0xff]  ;;  %v332_v20 = vld [vmem:[%s4583_s21 + $0x10] sm:$0xff]  ;;  %v333_v21 = vld [vmem:[%s4583_s21 + $0x18] sm:$0xff]  ;;  %1407 = vst.msk [vmem:[#allocation2 + $0x58] sm:$0x3] %vm1397_vm2, %v4421_v50 }
  0x2e   : > { %s316_s16 = sadd.f32 1e-08, %s315_s15  ;;  %v334_v22 = vld [vmem:[%s4583_s21 + $0x20] sm:$0xff]  ;;  %v335_v23 = vld [vmem:[%s4583_s21 + $0x28] sm:$0xff]  ;;  %v336_v24 = vld [vmem:[%s4583_s21 + $0x30] sm:$0xff]  ;;  %1408 = vst.msk [vmem:[#allocation2 + $0x60] sm:$0xff] %vm1394_vm1, %v4421_v50 }
  0x2f   : > { %v337_v25 = vld [vmem:[%s4583_s21 + $0x38] sm:$0xff]  ;;  %v338_v26 = vld [vmem:[%s4583_s21 + $0x40] sm:$0xff]  ;;  %v339_v27 = vld [vmem:[%s4583_s21 + $0x48] sm:$0xff]  ;;  %1409 = vst.msk [vmem:[#allocation2 + $0x68] sm:$0xff] %vm1394_vm1, %v4421_v50 }
  0x30   : > { %v317_v4 = vstv %s316_s16  ;;  %v340_v28 = vld [vmem:[%s4583_s21 + $0x50] sm:$0xff]  ;;  %v341_v29 = vld [vmem:[%s4583_s21 + $0x58] sm:$0xff]  ;;  %v342_v30 = vld [vmem:[%s4583_s21 + $0x60] sm:$0xff]  ;;  %1410 = vst.msk [vmem:[#allocation2 + $0x70] sm:$0x3] %vm1397_vm2, %v4421_v50 }
  0x31   : > { %4321 = vrcp.f32 %v317_v4  ;;  %v343_v31 = vld [vmem:[%s4583_s21 + $0x68] sm:$0xff]  ;;  %v344_v32 = vld [vmem:[%s4583_s21 + $0x70] sm:$0xff]  ;;  %v345_v33 = vld [vmem:[%s4583_s21 + $0x78] sm:$0xff]  ;;  %1411 = vst.msk [vmem:[#allocation2 + $0x78] sm:$0xff] %vm1394_vm1, %v4421_v50 }
  0x32   : > { %v346_v34 = vld [vmem:[%s4583_s21 + $0x80] sm:$0xff]  ;;  %v347_v35 = vld [vmem:[%s4583_s21 + $0x88] sm:$0xff]  ;;  %v348_v36 = vld [vmem:[%s4583_s21 + $0x90] sm:$0xff]  ;;  %1412 = vst.msk [vmem:[#allocation2 + $0x80] sm:$0xff] %vm1394_vm1, %v4421_v50 }
  0x33   : > { %v349_v37 = vld [vmem:[%s4583_s21 + $0x98] sm:$0xff]  ;;  %v350_v38 = vld [vmem:[%s4583_s21 + $0xa0] sm:$0xff]  ;;  %v351_v39 = vld [vmem:[%s4583_s21 + $0xa8] sm:$0xff]  ;;  %1413 = vst.msk [vmem:[#allocation2 + $0x88] sm:$0x3] %vm1397_vm2, %v4421_v50 }
  0x34   : > { %v352_v40 = vld [vmem:[%s4583_s21 + $0xb0] sm:$0xff]  ;;  %v353_v41 = vld [vmem:[%s4583_s21 + $0xb8] sm:$0xff]  ;;  %v354_v42 = vld [vmem:[%s4583_s21 + $0xc0] sm:$0xff]  ;;  %1414 = vst.msk [vmem:[#allocation2 + $0x90] sm:$0xff] %vm1394_vm1, %v4421_v50 }
  0x35   : > { %v355_v43 = vld [vmem:[%s4583_s21 + $0xc8] sm:$0xff]  ;;  %v356_v44 = vld [vmem:[%s4583_s21 + $0xd0] sm:$0xff]  ;;  %v357_v45 = vld [vmem:[%s4583_s21 + $0xd8] sm:$0xff]  ;;  %1415 = vst.msk [vmem:[#allocation2 + $0x98] sm:$0xff] %vm1394_vm1, %v4421_v50 }
  0x36   : > { %v358_v46 = vld [vmem:[%s4583_s21 + $0xe0] sm:$0xff]  ;;  %v359_v47 = vld [vmem:[%s4583_s21 + $0xe8] sm:$0xff]  ;;  %v360_v48 = vld [vmem:[%s4583_s21 + $0xf0] sm:$0xff]  ;;  %1416 = vst.msk [vmem:[#allocation2 + $0xa0] sm:$0x3] %vm1397_vm2, %v4421_v50 }
  0x37   : > { %v361_v49 = vld [vmem:[%s4583_s21 + $0xf8] sm:$0xff]  ;;  %1417 = vst.msk [vmem:[#allocation2 + $0xa8] sm:$0xff] %vm1394_vm1, %v4421_v50  ;;  %1418 = vst.msk [vmem:[#allocation2 + $0xb0] sm:$0xff] %vm1394_vm1, %v4421_v50  ;;  %v1515_v51 = vld [vmem:[#allocation2 + $0x1] sm:$0xff]  ;;  %s4427_s21 = smov 64  }
  0x38   : > { %1419 = vst.msk [vmem:[#allocation2 + $0xb8] sm:$0x3] %vm1397_vm2, %v4421_v50  ;;  %1422 = vst.msk [vmem:[#allocation2 + $0xd0] sm:$0x3] %vm1397_vm2, %v4421_v50  ;;  %v1516_v52 = vld [vmem:[#allocation2 + $0x9] sm:$0xff] }
  0x39   : > { %1420 = vst.msk [vmem:[#allocation2 + $0xc0] sm:$0xff] %vm1394_vm1, %v4421_v50  ;;  %1421 = vst.msk [vmem:[#allocation2 + $0xc8] sm:$0xff] %vm1394_vm1, %v4421_v50  ;;  %v3775_v53 = vpack.i.bf16 %v1516_v52, %v1515_v51  ;;  %v1547_v54 = vld [vmem:[#allocation2 + $0x2] sm:$0xff]  ;;  %v1548_v55 = vld [vmem:[#allocation2 + $0xa] sm:$0xff] }
  0x3a   : > { %1423 = vst.msk [vmem:[#allocation2 + $0xd8] sm:$0xff] %vm1394_vm1, %v4421_v50  ;;  %1424 = vst.msk [vmem:[#allocation2 + $0xe0] sm:$0xff] %vm1394_vm1, %v4421_v50  ;;  %v3780_v56 = vpack.i.bf16 %v1548_v55, %v1547_v54 }
  0x3b   : > { %1425 = vst.msk [vmem:[#allocation2 + $0xe8] sm:$0x3] %vm1397_vm2, %v4421_v50  ;;  %1428 = vst.msk [vmem:[#allocation2 + $0x100] sm:$0x3] %vm1397_vm2, %v4421_v50  ;;  %3776 = vrot.lane.b32.xlu0 %v3775_v53, %s4422_s13 }
  0x3c   : > { %1426 = vst.msk [vmem:[#allocation2 + $0xf0] sm:$0xff] %vm1394_vm1, %v4421_v50  ;;  %1427 = vst.msk [vmem:[#allocation2 + $0xf8] sm:$0xff] %vm1394_vm1, %v4421_v50 }
  0x3d   : > { %1429 = vst.msk [vmem:[#allocation2 + $0x108] sm:$0xff] %vm1394_vm1, %v4421_v50  ;;  %1430 = vst.msk [vmem:[#allocation2 + $0x110] sm:$0xff] %vm1394_vm1, %v4421_v50 }
  0x3e   : > { %v4322_v5 = vpop.eup %4321  ;;  %1431 = vst.msk [vmem:[#allocation2 + $0x118] sm:$0x3] %vm1397_vm2, %v4421_v50  ;;  %1434 = vst.msk [vmem:[#allocation2 + $0x130] sm:$0x3] %vm1397_vm2, %v4421_v50 }
  0x3f   : > { %3712 = vpush %v4322_v5 }
  0x40   : > { %1432 = vst.msk [vmem:[#allocation2 + $0x120] sm:$0xff] %vm1394_vm1, %v4421_v50  ;;  %1433 = vst.msk [vmem:[#allocation2 + $0x128] sm:$0xff] %vm1394_vm1, %v4421_v50 }
  0x41   : > { %1435 = vst.msk [vmem:[#allocation2 + $0x138] sm:$0xff] %vm1394_vm1, %v4421_v50  ;;  %1436 = vst.msk [vmem:[#allocation2 + $0x140] sm:$0xff] %vm1394_vm1, %v4421_v50 }
  0x42   : > { %1437 = vst.msk [vmem:[#allocation2 + $0x148] sm:$0x3] %vm1397_vm2, %v4421_v50  ;;  %1440 = vst.msk [vmem:[#allocation2 + $0x160] sm:$0x3] %vm1397_vm2, %v4421_v50 }
  0x43   : > { %1438 = vst.msk [vmem:[#allocation2 + $0x150] sm:$0xff] %vm1394_vm1, %v4421_v50  ;;  %1439 = vst.msk [vmem:[#allocation2 + $0x158] sm:$0xff] %vm1394_vm1, %v4421_v50 }
  0x44   : > { %1441 = vst.msk [vmem:[#allocation2 + $0x168] sm:$0xff] %vm1394_vm1, %v4421_v50  ;;  %1442 = vst.msk [vmem:[#allocation2 + $0x170] sm:$0xff] %vm1394_vm1, %v4421_v50 }
  0x45   : > { %1443 = vst.msk [vmem:[#allocation2 + $0x178] sm:$0x3] %vm1397_vm2, %v4421_v50  ;;  %1446 = vst.msk [vmem:[#allocation2 + $0x190] sm:$0x3] %vm1397_vm2, %v4421_v50 }
  0x46   : > { %1444 = vst.msk [vmem:[#allocation2 + $0x180] sm:$0xff] %vm1394_vm1, %v4421_v50  ;;  %1445 = vst.msk [vmem:[#allocation2 + $0x188] sm:$0xff] %vm1394_vm1, %v4421_v50 }
  0x47   : > { %1447 = vst.msk [vmem:[#allocation2 + $0x198] sm:$0xff] %vm1394_vm1, %v4421_v50  ;;  %1448 = vst.msk [vmem:[#allocation2 + $0x1a0] sm:$0xff] %vm1394_vm1, %v4421_v50 }
  0x48   : > { %1449 = vst.msk [vmem:[#allocation2 + $0x1a8] sm:$0x3] %vm1397_vm2, %v4421_v50 }
  0x4e   : > { %v1706_v57 = vld [vmem:[#allocation2 + $0x198] sm:$0xff] }
  0x70   : > { %s3713_s17 = spop %3712 }
  0x71   : > { %s321_s18 = smul.f32 %s3713_s17, %s314_s14  ;;  %s3528_s14 = sshll.u32 %s4493_s28, 9 }
  0x72   : > { %s320_s8 = smul.f32 %s3713_s17, %s4543_s29  ;;  %s4423_s17 = smov 32  }
  0x73   : > { %v364_v8 = vstv %s321_s18  ;;  %3781 = vrot.lane.b32.xlu0 %v3780_v56, %s4423_s17  ;;  %s4424_s18 = smov 96   ;;  %s4428_s29 = smov 112  }
  0x74   : > { %v365_v9 = vmul.f32 %v364_v8, %v362_v6  ;;  %v366_v10 = vmul.f32 %v364_v8, %v363_v7  ;;  %v1039_v16 = vstv %s320_s8  ;;  %s5807_s16 = scalar_lea.hbm %s5857_s7, %s3528_s14  ;;  %s4430_s28 = smov [#allocation6]  }
  0x75   : > { %v1040_v17 = vmul.f32 %v1039_v16, %v1038_v15 }
  0x76   : > { %3588 = vmatprep.mubr.msk.f32.mxu0 %vm367_vm0, %v365_v9  ;;  %3593 = vmatprep.mubr.msk.f32.mxu1 %vm367_vm0, %v365_v9 }
  0x77   : > { %3589 = vmatmul.mubr.msk.f32.vlgmr.msra.gmra.mxu0 %vm367_vm0, %v366_v10  ;;  %3594 = vmatmul.mubr.msk.f32.vlgmr.msra.gmra.mxu1 %vm367_vm0, %v366_v10 }
  0x78   : > { %3597 = vmatpush3.msra.mxu0 %v324_v2  ;;  %3598 = vmatprep.mubr.msk.f32.mxu0 %vm367_vm0, %v365_v9 }
  0x79   : > { %3603 = vmatprep.mubr.msk.f32.mxu1 %vm367_vm0, %v365_v9  ;;  %3602 = vmatpush3.msra.mxu1 %v325_v3 }
  0x7a   : > { %3606 = vmatprep.subr.mxu0 %v326_v11  ;;  %3611 = vmatprep.subr.mxu1 %v327_v12 }
  0x7b   : > { %3599 = vmatmul.mubr.msk.f32.vlgmr.msra.gmra.mxu0 %vm367_vm0, %v366_v10  ;;  %3604 = vmatmul.mubr.msk.f32.vlgmr.msra.gmra.mxu1 %vm367_vm0, %v366_v10 }
  0x7c   : > { %3607 = vmatpush3.msra.mxu0 %v326_v11  ;;  %3608 = vmatprep.mubr.msk.f32.mxu0 %vm367_vm0, %v365_v9 }
  0x7d   : > { %3613 = vmatprep.mubr.msk.f32.mxu1 %vm367_vm0, %v365_v9  ;;  %3612 = vmatpush3.msra.mxu1 %v327_v12 }
  0x7e   : > { %3616 = vmatprep.subr.mxu0 %v328_v13  ;;  %3621 = vmatprep.subr.mxu1 %v329_v14 }
  0x7f   : > { %3609 = vmatmul.mubr.msk.f32.vlgmr.msra.gmra.mxu0 %vm367_vm0, %v366_v10  ;;  %3614 = vmatmul.mubr.msk.f32.vlgmr.msra.gmra.mxu1 %vm367_vm0, %v366_v10 }
  0x80   : > { %3617 = vmatpush3.msra.mxu0 %v328_v13  ;;  %3618 = vmatprep.mubr.msk.f32.mxu0 %vm367_vm0, %v365_v9 }
  0x81   : > { %3623 = vmatprep.mubr.msk.f32.mxu1 %vm367_vm0, %v365_v9  ;;  %3626 = vmatprep.subr.mxu0 %v1040_v17 }
  0x82   : > { %3622 = vmatpush3.msra.mxu1 %v329_v14  ;;  %2504 = vrot.lane.b32.xlu0 %v1706_v57, %s4424_s18 }
  0x83   : > { %3619 = vmatmul.mubr.msk.f32.vlgmr.msra.gmra.mxu0 %vm367_vm0, %v366_v10  ;;  %3624 = vmatmul.mubr.msk.f32.vlgmr.msra.gmra.mxu1 %vm367_vm0, %v366_v10 }
  0x84   : > { %3627 = vmatpush3.msra.mxu0 %v1040_v17  ;;  %3628 = vmatprep.mubr.msk.f32.mxu0 %vm367_vm0, %v330_v18 }
  0x85   : > { %3676 = vmatprep.subr.mxu1 %v4421_v50  ;;  %3012 = vmatprep.subr.mxu0 %v4421_v50 }
  0x87   : > { %3629 = vmatmul.mubr.msk.f32.vlgmr.msra.gmra.mxu0 %vm367_vm0, %v331_v19 }
  0x88   : > { %3631 = vmatprep.mubr.msk.f32.mxu0 %vm367_vm0, %v332_v20 }
  0x8b   : > { %3632 = vmatmul.mubr.msk.f32.gmra.mxu0 %vm367_vm0, %v333_v21 }
  0x8c   : > { %3634 = vmatprep.mubr.msk.f32.mxu0 %vm367_vm0, %v334_v22 }
  0x8f   : > { %3635 = vmatmul.mubr.msk.f32.gmra.mxu0 %vm367_vm0, %v335_v23 }
  0x90   : > { %3637 = vmatprep.mubr.msk.f32.mxu0 %vm367_vm0, %v336_v24 }
  0x93   : > { %3638 = vmatmul.mubr.msk.f32.gmra.mxu0 %vm367_vm0, %v337_v25 }
  0x94   : > { %3640 = vmatprep.mubr.msk.f32.mxu0 %vm367_vm0, %v338_v26 }
  0x97   : > { %3641 = vmatmul.mubr.msk.f32.gmra.mxu0 %vm367_vm0, %v339_v27 }
  0x98   : > { %3643 = vmatprep.mubr.msk.f32.mxu0 %vm367_vm0, %v340_v28 }
  0x9b   : > { %3644 = vmatmul.mubr.msk.f32.gmra.mxu0 %vm367_vm0, %v341_v29 }
  0x9c   : > { %3646 = vmatprep.mubr.msk.f32.mxu0 %vm367_vm0, %v342_v30 }
  0x9f   : > { %3647 = vmatmul.mubr.msk.f32.gmra.mxu0 %vm367_vm0, %v343_v31 }
  0xa0   : > { %3649 = vmatprep.mubr.msk.f32.mxu0 %vm367_vm0, %v344_v32 }
  0xa3   : > { %3650 = vmatmul.mubr.msk.f32.gmra.mxu0 %vm367_vm0, %v345_v33 }
  0xa4   : > { %3652 = vmatprep.mubr.msk.f32.mxu0 %vm367_vm0, %v346_v34 }
  0xa7   : > { %3653 = vmatmul.mubr.msk.f32.gmra.mxu0 %vm367_vm0, %v347_v35 }
  0xa8   : > { %3655 = vmatprep.mubr.msk.f32.mxu0 %vm367_vm0, %v348_v36 }
  0xab   : > { %3656 = vmatmul.mubr.msk.f32.gmra.mxu0 %vm367_vm0, %v349_v37 }
  0xac   : > { %3658 = vmatprep.mubr.msk.f32.mxu0 %vm367_vm0, %v350_v38 }
  0xaf   : > { %3659 = vmatmul.mubr.msk.f32.gmra.mxu0 %vm367_vm0, %v351_v39 }
  0xb0   : > { %3661 = vmatprep.mubr.msk.f32.mxu0 %vm367_vm0, %v352_v40 }
  0xb3   : > { %3662 = vmatmul.mubr.msk.f32.gmra.mxu0 %vm367_vm0, %v353_v41 }
  0xb4   : > { %3664 = vmatprep.mubr.msk.f32.mxu0 %vm367_vm0, %v354_v42 }
  0xb7   : > { %3665 = vmatmul.mubr.msk.f32.gmra.mxu0 %vm367_vm0, %v355_v43 }
  0xb8   : > { %3667 = vmatprep.mubr.msk.f32.mxu0 %vm367_vm0, %v356_v44 }
  0xbb   : > { %3668 = vmatmul.mubr.msk.f32.gmra.mxu0 %vm367_vm0, %v357_v45 }
  0xbc   : > { %3670 = vmatprep.mubr.msk.f32.mxu0 %vm367_vm0, %v358_v46 }
  0xbf   : > { %3671 = vmatmul.mubr.msk.f32.gmra.mxu0 %vm367_vm0, %v359_v47 }
  0xc0   : > { %3673 = vmatprep.mubr.msk.f32.mxu0 %vm367_vm0, %v360_v48 }
  0xc3   : > { %3674 = vmatmul.mubr.msk.f32.gmra.mxu0 %vm367_vm0, %v361_v49 }
 0x137   : > { %v3590_v58 = vpop.f32.mrf.mxu0  ;;  %v3595_v63 = vpop.f32.mrf.mxu1 }
 0x138   : > { %v975_v1 = vmul.f32 0.25, %v3590_v58  ;;  %v989_v2 = vmul.f32 0.75, %v3590_v58  ;;  %v977_v8 = vmul.f32 0.25, %v3595_v63  ;;  %v991_v15 = vmul.f32 0.75, %v3595_v63 }
 0x139   : > { %v440_v59 = vpop.f32.mrf.mxu0  ;;  %v515_v6 = vpop.f32.mrf.mxu1 }
 0x13a   : > { %v974_v4 = vmul.f32 0.25, %v440_v59  ;;  %v988_v5 = vmul.f32 0.75, %v440_v59  ;;  %v1005_v9 = vadd.f32 %v989_v2, %v975_v1  ;;  %v976_v11 = vmul.f32 0.25, %v515_v6 }
 0x13b   : > { %v3600_v60 = vpop.f32.mrf.mxu0  ;;  %v1023_v17 = vadd.f32 %v989_v2, %v977_v8  ;;  %v990_v19 = vmul.f32 0.75, %v515_v6  ;;  %v1007_v25 = vadd.f32 %v991_v15, %v975_v1  ;;  %v3605_v27 = vpop.f32.mrf.mxu1 }
 0x13c   : > { %v1004_v13 = vadd.f32 %v988_v5, %v974_v4  ;;  %v1022_v21 = vadd.f32 %v988_v5, %v976_v11  ;;  %v4778_v23 = vmul.f32 0.25, %v3600_v60  ;;  %v993_v32 = vmul.f32 0.75, %v3600_v60 }
 0x13d   : > { %v590_v61 = vpop.f32.mrf.mxu0  ;;  %v1006_v30 = vadd.f32 %v990_v19, %v974_v4  ;;  %v665_v41 = vpop.f32.mrf.mxu1  ;;  %v4800_v49 = vmul.f32 0.25, %v3605_v27  ;;  %v995_v4 = vmul.f32 0.75, %v3605_v27 }
 0x13e   : > { %v4781_v28 = vmul.f32 0.25, %v590_v61  ;;  %v1025_v34 = vadd.f32 %v991_v15, %v4778_v23  ;;  %v992_v36 = vmul.f32 0.75, %v590_v61  ;;  %v1009_v52 = vadd.f32 %v993_v32, %v977_v8 }
 0x13f   : > { %v4768_v62 = vpop.f32.mrf.mxu0  ;;  %v4805_v53 = vmul.f32 0.25, %v665_v41  ;;  %v1027_v6 = vadd.f32 %v993_v32, %v4800_v49  ;;  %v994_v8 = vmul.f32 0.75, %v665_v41 }
 0x140   : > { %v1024_v43 = vadd.f32 %v990_v19, %v4781_v28  ;;  %v1008_v59 = vadd.f32 %v992_v36, %v976_v11  ;;  %v4841_v19 = vmul.f32 0.25, %v4768_v62 }
 0x141   : > { %v4770_v0 = vpop.f32.mrf.mxu0 }
 0x142   : > { %v1029_v41 = vadd.f32 %v995_v4, %v4841_v19 }
 0x143   : > { %v4772_v3 = vpop.f32.mrf.mxu0 }
 0x145   : > { %v4774_v7 = vpop.f32.mrf.mxu0 }
 0x147   : > { %v3630_v10 = vpop.f32.mrf.mxu0 }
 0x148   : > { %v1363_v12 = vadd.f32 %v3630_v10, %v1005_v9 }
 0x149   : > { %v1203_v14 = vpop.f32.mrf.mxu0 }
 0x14a   : > { %1452 = vst.msk [vmem:[#allocation2 + $0x21] sm:$0xff] %vm1394_vm1, %v1363_v12  ;;  %v1362_v16 = vadd.f32 %v1203_v14, %v1004_v13  ;;  %v1026_v12 = vadd.f32 %v992_v36, %v4805_v53  ;;  %v997_v36 = vmul.f32 0.75, %v4768_v62 }
 0x14b   : > { %v3633_v18 = vpop.f32.mrf.mxu0 }
 0x14c   : > { %1451 = vst.msk [vmem:[#allocation2 + $0x19] sm:$0xff] %vm1394_vm1, %v1362_v16  ;;  %v1365_v20 = vadd.f32 %v3633_v18, %v1023_v17 }
 0x14d   : > { %v1213_v22 = vpop.f32.mrf.mxu0 }
 0x14e   : > { %1454 = vst.msk [vmem:[#allocation2 + $0x39] sm:$0xff] %vm1394_vm1, %v1365_v20  ;;  %v1364_v24 = vadd.f32 %v1213_v22, %v1022_v21  ;;  %v1011_v21 = vadd.f32 %v995_v4, %v4778_v23  ;;  %v4848_v22 = vmul.f32 0.25, %v4770_v0  ;;  %v2913_v23 = vld [vmem:[%s5855_s5 + $0x78] sm:$0xff]  ;;  %v2910_v4 = vld [vmem:[%s5855_s5 + $0x60] sm:$0xff] }
 0x14f   : > { %v3636_v26 = vpop.f32.mrf.mxu0  ;;  %3694 = vmatpush1.msra.mxu1 %v2913_v23  ;;  %3013 = vmatpush1.msra.mxu0 %v2913_v23 }
 0x150   : > { %1453 = vst.msk [vmem:[#allocation2 + $0x31] sm:$0xff] %vm1394_vm1, %v1364_v24  ;;  %v1367_v29 = vadd.f32 %v3636_v26, %v1007_v25  ;;  %v4852_v26 = vpop.f32.mrf.mxu1  ;;  %3677 = vmatprep.subr.mxu1 %v4421_v50  ;;  %3014 = vmatprep.subr.mxu0 %v4421_v50 }
 0x151   : > { %v1223_v31 = vpop.f32.mrf.mxu0  ;;  %v4786_v35 = vld [vmem:[#allocation2 + $0x22] sm:$0xff] }
 0x152   : > { %1456 = vst.msk [vmem:[#allocation2 + $0x51] sm:$0xff] %vm1394_vm1, %v1367_v29  ;;  %v1366_v33 = vadd.f32 %v1223_v31, %v1006_v30  ;;  %v4792_v40 = vld [vmem:[#allocation2 + $0x21] sm:$0xff]  ;;  %v1010_v29 = vadd.f32 %v994_v8, %v4781_v28  ;;  %v2912_v28 = vld [vmem:[%s5855_s5 + $0x70] sm:$0xff]  ;;  %v815_v62 = vpop.f32.mrf.mxu1 }
 0x153   : > { %v3639_v37 = vpop.f32.mrf.mxu0  ;;  %v4788_v38 = vld [vmem:[#allocation2 + $0x1a] sm:$0xff]  ;;  %3695 = vmatpush1.msra.mxu1 %v2912_v28  ;;  %3015 = vmatpush1.msra.mxu0 %v2912_v28 }
 0x154   : > { %v4790_v39 = vld [vmem:[#allocation2 + $0x19] sm:$0xff]  ;;  %1455 = vst.msk [vmem:[#allocation2 + $0x49] sm:$0xff] %vm1394_vm1, %v1366_v33  ;;  %v1369_v42 = vadd.f32 %v3639_v37, %v1025_v34  ;;  %v3790_v44 = vpack.i.bf16 %v4786_v35, %v4788_v38  ;;  %3678 = vmatprep.subr.mxu1 %v4421_v50  ;;  %3016 = vmatprep.subr.mxu0 %v4421_v50 }
 0x155   : > { %v3785_v45 = vpack.i.bf16 %v4792_v40, %v4790_v39  ;;  %v1233_v46 = vpop.f32.mrf.mxu0  ;;  %v1579_v47 = vld [vmem:[#allocation2 + $0x18] sm:$0xff]  ;;  %v1580_v48 = vld [vmem:[#allocation2 + $0x20] sm:$0xff] }
 0x156   : > { %1458 = vst.msk [vmem:[#allocation2 + $0x69] sm:$0xff] %vm1394_vm1, %v1369_v42  ;;  %v1368_v51 = vadd.f32 %v1233_v46, %v1024_v43  ;;  %3791 = vrot.lane.b32.xlu1 %v3790_v44, %s4423_s17  ;;  %v4811_v57 = vld [vmem:[#allocation2 + $0x39] sm:$0xff]  ;;  %v3795_v60 = vpack.i.bf16 %v1580_v48, %v1579_v47  ;;  %v996_v42 = vmul.f32 0.75, %v4770_v0  ;;  %v1028_v44 = vadd.f32 %v994_v8, %v4848_v22 }
 0x157   : > { %3786 = vrot.lane.b32.xlu0 %v3785_v45, %s4422_s13  ;;  %v3642_v54 = vpop.f32.mrf.mxu0  ;;  %v4807_v55 = vld [vmem:[#allocation2 + $0x32] sm:$0xff]  ;;  %v4826_v10 = vld [vmem:[#allocation2 + $0x3a] sm:$0xff] }
 0x158   : > { %v4809_v56 = vld [vmem:[#allocation2 + $0x31] sm:$0xff]  ;;  %1457 = vst.msk [vmem:[#allocation2 + $0x61] sm:$0xff] %vm1394_vm1, %v1368_v51  ;;  %v1371_v58 = vadd.f32 %v3642_v54, %v1009_v52  ;;  %3489 = vmatprep.mubr.msk.f32.mxu0 %vm1394_vm1, %v4807_v55  ;;  %v3805_v13 = vpack.i.bf16 %v4826_v10, %v4807_v55  ;;  %v2911_v51 = vld [vmem:[%s5855_s5 + $0x68] sm:$0xff]  ;;  %v1012_v8 = vadd.f32 %v996_v42, %v4805_v53 }
 0x159   : > { %v3800_v61 = vpack.i.bf16 %v4811_v57, %v4809_v56  ;;  %v1243_v63 = vpop.f32.mrf.mxu0  ;;  %v4818_v1 = vld [vmem:[#allocation2 + $0x30] sm:$0xff]  ;;  %v4820_v2 = vld [vmem:[#allocation2 + $0x38] sm:$0xff]  ;;  %3696 = vmatpush1.msra.mxu1 %v2911_v51  ;;  %3017 = vmatpush1.msra.mxu0 %v2911_v51 }
 0x15a   : > { %1460 = vst.msk [vmem:[#allocation2 + $0x81] sm:$0xff] %vm1394_vm1, %v1371_v58  ;;  %v1370_v5 = vadd.f32 %v1243_v63, %v1008_v59  ;;  %v3810_v14 = vpack.i.bf16 %v4820_v2, %v4818_v1  ;;  %v4850_v25 = vld [vmem:[#allocation2 + $0x51] sm:$0xff]  ;;  %v1013_v63 = vadd.f32 %v997_v36, %v4800_v49  ;;  %3679 = vmatprep.subr.mxu1 %v4421_v50 }
 0x15b   : > { %3796 = vrot.lane.b32.xlu0 %v3795_v60, %s4425_s19  ;;  %3801 = vrot.lane.b32.xlu1 %v3800_v61, %s4422_s13  ;;  %v3645_v9 = vpop.f32.mrf.mxu0  ;;  %v4834_v16 = vld [vmem:[#allocation2 + $0x48] sm:$0xff]  ;;  %v4836_v17 = vld [vmem:[#allocation2 + $0x50] sm:$0xff]  ;;  %v4900_v60 = vmul.f32 0.25, %v4852_v26 }
 0x15c   : > { %1459 = vst.msk [vmem:[#allocation2 + $0x79] sm:$0xff] %vm1394_vm1, %v1370_v5  ;;  %v1373_v11 = vadd.f32 %v3645_v9, %v1027_v6  ;;  %v4838_v18 = vld [vmem:[#allocation2 + $0x49] sm:$0xff]  ;;  %v3825_v30 = vpack.i.bf16 %v4836_v17, %v4834_v16  ;;  %v4877_v45 = vld [vmem:[#allocation2 + $0x52] sm:$0xff]  ;;  %v4909_v5 = vmul.f32 0.25, %v815_v62  ;;  %3018 = vmatprep.subr.mxu0 %v4421_v50  ;;  %3697 = vmatpush1.msra.mxu1 %v2910_v4 }
 0x15d   : > { %v1253_v15 = vpop.f32.mrf.mxu0  ;;  %v3815_v31 = vpack.i.bf16 %v4850_v25, %v4838_v18  ;;  %v4863_v33 = vld [vmem:[#allocation2 + $0x4a] sm:$0xff]  ;;  %3019 = vmatpush1.msra.mxu0 %v2910_v4  ;;  %3680 = vmatprep.subr.mxu1 %v4421_v50  ;;  %v3625_v4 = vpop.f32.mrf.mxu1 }
 0x15e   : > { %1462 = vst.msk [vmem:[#allocation2 + $0x99] sm:$0xff] %vm1394_vm1, %v1373_v11  ;;  %v1372_v20 = vadd.f32 %v1253_v15, %v1026_v12  ;;  %v4879_v46 = vld [vmem:[#allocation2 + $0x69] sm:$0xff]  ;;  %v3820_v48 = vpack.i.bf16 %v4877_v45, %v4863_v33  ;;  %3020 = vmatprep.subr.mxu0 %v4421_v50 }
 0x15f   : > { %3806 = vrot.lane.b32.xlu0 %v3805_v13, %s4423_s17  ;;  %3811 = vrot.lane.b32.xlu1 %v3810_v14, %s4425_s19  ;;  %v3648_v24 = vpop.f32.mrf.mxu0  ;;  %v4865_v34 = vld [vmem:[#allocation2 + $0x61] sm:$0xff]  ;;  %v4912_v9 = vld [vmem:[#allocation2 + $0x6a] sm:$0xff] }
 0x160   : > { %1461 = vst.msk [vmem:[#allocation2 + $0x91] sm:$0xff] %vm1394_vm1, %v1372_v20  ;;  %v1375_v27 = vadd.f32 %v3648_v24, %v1011_v21  ;;  %v3830_v0 = vpack.i.bf16 %v4879_v46, %v4865_v34  ;;  %v4891_v54 = vld [vmem:[#allocation2 + $0x60] sm:$0xff]  ;;  %v4893_v58 = vld [vmem:[#allocation2 + $0x68] sm:$0xff]  ;;  %v2909_v20 = vld [vmem:[%s5855_s5 + $0x58] sm:$0xff]  ;;  %v999_v21 = vmul.f32 0.75, %v4852_v26 }
 0x161   : > { %v1263_v32 = vpop.f32.mrf.mxu0  ;;  %v4895_v59 = vld [vmem:[#allocation2 + $0x62] sm:$0xff]  ;;  %v3840_v12 = vpack.i.bf16 %v4893_v58, %v4891_v54  ;;  %3698 = vmatpush1.msra.mxu1 %v2909_v20  ;;  %3021 = vmatpush1.msra.mxu0 %v2909_v20 }
 0x162   : > { %1464 = vst.msk [vmem:[#allocation2 + $0xb1] sm:$0xff] %vm1394_vm1, %v1375_v27  ;;  %v1374_v37 = vadd.f32 %v1263_v32, %v1010_v29  ;;  %v3835_v49 = vpack.i.bf16 %v4912_v9, %v4895_v59  ;;  %v1031_v27 = vadd.f32 %v997_v36, %v4900_v60  ;;  %v998_v29 = vmul.f32 0.75, %v815_v62  ;;  %v4930_v23 = vld [vmem:[#allocation2 + $0x81] sm:$0xff]  ;;  %v2908_v36 = vld [vmem:[%s5855_s5 + $0x50] sm:$0xff]  ;;  %3681 = vmatprep.subr.mxu1 %v4421_v50 }
 0x163   : > { %3826 = vrot.lane.b32.xlu0 %v3825_v30, %s4425_s19  ;;  %3816 = vrot.lane.b32.xlu1 %v3815_v31, %s4422_s13  ;;  %v3651_v43 = vpop.f32.mrf.mxu0  ;;  %v1587_v13 = vld [vmem:[#allocation2 + $0x78] sm:$0xff]  ;;  %v1588_v53 = vld [vmem:[#allocation2 + $0x80] sm:$0xff]  ;;  %v1030_v31 = vadd.f32 %v996_v42, %v4909_v5  ;;  %v1015_v62 = vadd.f32 %v999_v21, %v4841_v19 }
 0x164   : > { %1463 = vst.msk [vmem:[#allocation2 + $0xa9] sm:$0xff] %vm1394_vm1, %v1374_v37  ;;  %v1377_v47 = vadd.f32 %v3651_v43, %v1029_v41  ;;  %v1525_v15 = vld [vmem:[#allocation2 + $0x79] sm:$0xff]  ;;  %v3855_v32 = vpack.i.bf16 %v1588_v53, %v1587_v13  ;;  %3022 = vmatprep.subr.mxu0 %v4421_v50  ;;  %v4942_v43 = vmul.f32 0.25, %v4772_v3  ;;  %3699 = vmatpush1.msra.mxu1 %v2908_v36 }
 0x165   : > { %v1273_v52 = vpop.f32.mrf.mxu0  ;;  %v3845_v28 = vpack.i.bf16 %v4930_v23, %v1525_v15  ;;  %v1557_v41 = vld [vmem:[#allocation2 + $0x7a] sm:$0xff]  ;;  %3023 = vmatpush1.msra.mxu0 %v2908_v36  ;;  %3682 = vmatprep.subr.mxu1 %v4421_v50 }
 0x166   : > { %1466 = vst.msk [vmem:[#allocation2 + $0xc9] sm:$0xff] %vm1394_vm1, %v1377_v47  ;;  %v1376_v61 = vadd.f32 %v1273_v52, %v1028_v44  ;;  %v2907_v47 = vld [vmem:[%s5855_s5 + $0x48] sm:$0xff]  ;;  %v1014_v52 = vadd.f32 %v998_v29, %v4848_v22  ;;  %v2906_v13 = vld [vmem:[%s5855_s5 + $0x40] sm:$0xff]  ;;  %3024 = vmatprep.subr.mxu0 %v4421_v50  ;;  %v1033_v15 = vadd.f32 %v999_v21, %v4942_v43  ;;  %v2905_v21 = vld [vmem:[%s5855_s5 + $0x38] sm:$0xff] }
 0x167   : > { %3821 = vrot.lane.b32.xlu1 %v3820_v48, %s4423_s17  ;;  %3831 = vrot.lane.b32.xlu0 %v3830_v0, %s4422_s13  ;;  %v3654_v6 = vpop.f32.mrf.mxu0  ;;  %v1527_v42 = vld [vmem:[#allocation2 + $0x91] sm:$0xff]  ;;  %v4952_v48 = vmul.f32 0.25, %v4774_v7 }
 0x168   : > { %1465 = vst.msk [vmem:[#allocation2 + $0xc1] sm:$0xff] %vm1394_vm1, %v1376_v61  ;;  %v1379_v11 = vadd.f32 %v3654_v6, %v1013_v63  ;;  %v1558_v61 = vld [vmem:[#allocation2 + $0x82] sm:$0xff]  ;;  %v1528_v63 = vld [vmem:[#allocation2 + $0x99] sm:$0xff]  ;;  %3700 = vmatpush1.msra.mxu1 %v2907_v47  ;;  %3025 = vmatpush1.msra.mxu0 %v2907_v47 }
 0x169   : > { %v1283_v14 = vpop.f32.mrf.mxu0  ;;  %v3850_v6 = vpack.i.bf16 %v1558_v61, %v1557_v41  ;;  %v1559_v22 = vld [vmem:[#allocation2 + $0x92] sm:$0xff]  ;;  %3683 = vmatprep.subr.mxu1 %v4421_v50  ;;  %3026 = vmatprep.subr.mxu0 %v4421_v50 }
 0x16a   : > { %1468 = vst.msk [vmem:[#allocation2 + $0xe1] sm:$0xff] %vm1394_vm1, %v1379_v11  ;;  %v1378_v24 = vadd.f32 %v1283_v14, %v1012_v8  ;;  %v3860_v8 = vpack.i.bf16 %v1528_v63, %v1527_v42  ;;  %v4960_v11 = vld [vmem:[#allocation2 + $0x90] sm:$0xff]  ;;  %v1001_v14 = vmul.f32 0.75, %v4772_v3  ;;  %3701 = vmatpush1.msra.mxu1 %v2906_v13  ;;  %3027 = vmatpush1.msra.mxu0 %v2906_v13 }
 0x16b   : > { %3841 = vrot.lane.b32.xlu1 %v3840_v12, %s4425_s19  ;;  %3836 = vrot.lane.b32.xlu0 %v3835_v49, %s4423_s17  ;;  %v3657_v30 = vpop.f32.mrf.mxu0  ;;  %v4963_v49 = vld [vmem:[#allocation2 + $0x98] sm:$0xff]  ;;  %v4986_v36 = vld [vmem:[#allocation2 + $0xb0] sm:$0xff] }
 0x16c   : > { %1467 = vst.msk [vmem:[#allocation2 + $0xd9] sm:$0xff] %vm1394_vm1, %v1378_v24  ;;  %v1381_v26 = vadd.f32 %v3657_v30, %v1031_v27  ;;  %v1032_v24 = vadd.f32 %v998_v29, %v4952_v48  ;;  %v1560_v27 = vld [vmem:[#allocation2 + $0x9a] sm:$0xff]  ;;  %v1000_v30 = vmul.f32 0.75, %v4774_v7  ;;  %v1529_v7 = vld [vmem:[#allocation2 + $0xa9] sm:$0xff]  ;;  %3684 = vmatprep.subr.mxu1 %v4421_v50  ;;  %v1017_v42 = vadd.f32 %v1001_v14, %v4900_v60 }
 0x16d   : > { %v1293_v37 = vpop.f32.mrf.mxu0  ;;  %3702 = vmatpush1.msra.mxu1 %v2905_v21  ;;  %3028 = vmatprep.subr.mxu0 %v4421_v50 }
 0x16e   : > { %1470 = vst.msk [vmem:[#allocation2 + $0xf9] sm:$0xff] %vm1394_vm1, %v1381_v26  ;;  %v1380_v44 = vadd.f32 %v1293_v37, %v1030_v31  ;;  %v965_v31 = vpop.f32.mrf.mxu1  ;;  %v3870_v26 = vpack.i.bf16 %v4963_v49, %v4960_v11  ;;  %v4989_v37 = vmul.f32 0.25, %v3625_v4  ;;  %v1016_v61 = vadd.f32 %v1000_v30, %v4909_v5  ;;  %3685 = vmatprep.subr.mxu1 %v4421_v50 }
 0x16f   : > { %3856 = vrot.lane.b32.xlu0 %v3855_v32, %s4425_s19  ;;  %3846 = vrot.lane.b32.xlu1 %v3845_v28, %s4422_s13  ;;  %v3660_v0 = vpop.f32.mrf.mxu0  ;;  %v4954_v51 = vld [vmem:[#allocation2 + $0xc2] sm:$0xff]  ;;  %v3865_v32 = vpack.i.bf16 %v1560_v27, %v1559_v22 }
 0x170   : > { %1469 = vst.msk [vmem:[#allocation2 + $0xf1] sm:$0xff] %vm1394_vm1, %v1380_v44  ;;  %v1383_v19 = vadd.f32 %v3660_v0, %v1015_v62  ;;  %3501 = vmatprep.mubr.msk.f32.mxu1 %vm1394_vm1, %v4954_v51  ;;  %v4984_v28 = vld [vmem:[#allocation2 + $0xa8] sm:$0xff]  ;;  %v2904_v44 = vld [vmem:[%s5855_s5 + $0x30] sm:$0xff]  ;;  %v4998_v62 = vmul.f32 0.25, %v965_v31  ;;  %3029 = vmatpush1.msra.mxu0 %v2905_v21  ;;  %v1035_v5 = vadd.f32 %v4989_v37, %v1001_v14  ;;  %v2902_v27 = vld [vmem:[%s5855_s5 + $0x20] sm:$0xff] }
 0x171   : > { %v1303_v12 = vpop.f32.mrf.mxu0  ;;  %v1530_v0 = vld [vmem:[#allocation2 + $0xb1] sm:$0xff]  ;;  %v3885_v63 = vpack.i.bf16 %v4986_v36, %v4984_v28  ;;  %3703 = vmatpush1.msra.mxu1 %v2904_v44  ;;  %3030 = vmatprep.subr.mxu0 %v4421_v50  ;;  %v1532_v21 = vld [vmem:[#allocation2 + $0xc9] sm:$0xff] }
 0x172   : > { %1472 = vst.msk [vmem:[#allocation2 + $0x111] sm:$0xff] %vm1394_vm1, %v1383_v19  ;;  %v1382_v53 = vadd.f32 %v1303_v12, %v1014_v52  ;;  %v3875_v60 = vpack.i.bf16 %v1530_v0, %v1529_v7  ;;  %v1003_v12 = vmul.f32 0.75, %v3625_v4  ;;  %3686 = vmatprep.subr.mxu1 %v4421_v50  ;;  %v1034_v4 = vadd.f32 %v4998_v62, %v1000_v30  ;;  %v2900_v0 = vld [vmem:[%s5855_s5 + $0x10] sm:$0xff] }
 0x173   : > { %3851 = vrot.lane.b32.xlu1 %v3850_v6, %s4423_s17  ;;  %3861 = vrot.lane.b32.xlu0 %v3860_v8, %s4422_s13  ;;  %v3663_v20 = vpop.f32.mrf.mxu0  ;;  %v1655_v6 = vld [vmem:[#allocation2 + $0xaa] sm:$0xff] }
 0x174   : > { %1471 = vst.msk [vmem:[#allocation2 + $0x109] sm:$0xff] %vm1394_vm1, %v1382_v53  ;;  %v1385_v3 = vadd.f32 %v3663_v20, %v1033_v15  ;;  %v5009_v8 = vld [vmem:[%s5855_s5 + $0x28] sm:$0xff]  ;;  %v1656_v53 = vld [vmem:[#allocation2 + $0xb2] sm:$0xff]  ;;  %v1002_v15 = vmul.f32 0.75, %v965_v31  ;;  %v1019_v30 = vadd.f32 %v1003_v12, %v4942_v43  ;;  %3031 = vmatpush1.msra.mxu0 %v2904_v44 }
 0x175   : > { %v1313_v29 = vpop.f32.mrf.mxu0  ;;  %3704 = vmatpush1.msra.mxu1 %v5009_v8  ;;  %v2901_v31 = vld [vmem:[%s5855_s5 + $0x18] sm:$0xff]  ;;  %v5036_v43 = vld [vmem:[#allocation2 + $0xc8] sm:$0xff]  ;;  %3032 = vmatprep.subr.mxu0 %v4421_v50 }
 0x176   : > { %1474 = vst.msk [vmem:[#allocation2 + $0x129] sm:$0xff] %vm1394_vm1, %v1385_v3  ;;  %v1384_v41 = vadd.f32 %v1313_v29, %v1032_v24  ;;  %v3895_v24 = vpack.i.bf16 %v1656_v53, %v1655_v6  ;;  %v1531_v3 = vld [vmem:[#allocation2 + $0xc1] sm:$0xff]  ;;  %3687 = vmatprep.subr.mxu1 %v4421_v50  ;;  %v1018_v7 = vadd.f32 %v1002_v15, %v4952_v48  ;;  %v1533_v53 = vld [vmem:[#allocation2 + $0xd9] sm:$0xff] }
 0x177   : > { %3871 = vrot.lane.b32.xlu1 %v3870_v26, %s4425_s19  ;;  %3866 = vrot.lane.b32.xlu0 %v3865_v32, %s4423_s17  ;;  %v3666_v47 = vpop.f32.mrf.mxu0  ;;  %v1037_v48 = vadd.f32 %v4989_v37, %v1003_v12  ;;  %v2899_v37 = vld [vmem:[%s5855_s5 + $0x8] sm:$0xff] }
 0x178   : > { %1473 = vst.msk [vmem:[#allocation2 + $0x121] sm:$0xff] %vm1394_vm1, %v1384_v41  ;;  %v1387_v52 = vadd.f32 %v3666_v47, %v1017_v42  ;;  %3705 = vmatpush1.msra.mxu1 %v2902_v27  ;;  %v3900_v41 = vpack.i.bf16 %v1532_v21, %v1531_v3  ;;  %v5034_v47 = vld [vmem:[#allocation2 + $0xc0] sm:$0xff]  ;;  %3033 = vmatpush1.msra.mxu0 %v5009_v8 }
 0x179   : > { %v1323_v19 = vpop.f32.mrf.mxu0  ;;  %3688 = vmatprep.subr.mxu1 %v4421_v50  ;;  %v3910_v6 = vpack.i.bf16 %v5036_v43, %v5034_v47  ;;  %3034 = vmatprep.subr.mxu0 %v4421_v50  ;;  %v2914_v8 = vld [vmem:[%s5855_s5 + $0x80] sm:$0xff] }
 0x17a   : > { %1476 = vst.msk [vmem:[#allocation2 + $0x141] sm:$0xff] %vm1394_vm1, %v1387_v52  ;;  %v1386_v22 = vadd.f32 %v1323_v19, %v1016_v61  ;;  %3706 = vmatpush1.msra.mxu1 %v2901_v31  ;;  %v5045_v61 = vld [vmem:[#allocation2 + $0xca] sm:$0xff]  ;;  %v1036_v19 = vadd.f32 %v4998_v62, %v1002_v15  ;;  %v2898_v62 = vld [vmem:[%s5855_s5] sm:$0xff]  ;;  %3035 = vmatpush1.msra.mxu0 %v2902_v27 }
 0x17b   : > { %3886 = vrot.lane.b32.xlu0 %v3885_v63, %s4425_s19  ;;  %3876 = vrot.lane.b32.xlu1 %v3875_v60, %s4422_s13  ;;  %v3669_v13 = vpop.f32.mrf.mxu0  ;;  %v1534_v15 = vld [vmem:[#allocation2 + $0xe1] sm:$0xff] }
 0x17c   : > { %1475 = vst.msk [vmem:[#allocation2 + $0x139] sm:$0xff] %vm1394_vm1, %v1386_v22  ;;  %v1389_v20 = vadd.f32 %v3669_v13, %v1035_v5  ;;  %3689 = vmatprep.subr.mxu1 %v4421_v50  ;;  %v5078_v5 = vld [vmem:[#allocation2 + $0xd8] sm:$0xff]  ;;  %v5080_v13 = vld [vmem:[#allocation2 + $0xe0] sm:$0xff]  ;;  %3036 = vmatprep.subr.mxu0 %v4421_v50 }
 0x17d   : > { %v1333_v14 = vpop.f32.mrf.mxu0  ;;  %3707 = vmatpush1.msra.mxu1 %v2900_v0  ;;  %3037 = vmatpush1.msra.mxu0 %v2901_v31  ;;  %v1566_v27 = vld [vmem:[#allocation2 + $0xe2] sm:$0xff]  ;;  %v1662_v3 = vld [vmem:[#allocation2 + $0xfa] sm:$0xff]  ;;  %v1535_v31 = vld [vmem:[#allocation2 + $0xf1] sm:$0xff] }
 0x17e   : > { %1478 = vst.msk [vmem:[#allocation2 + $0x159] sm:$0xff] %vm1394_vm1, %v1389_v20  ;;  %v1388_v26 = vadd.f32 %v1333_v14, %v1034_v4  ;;  %3690 = vmatprep.subr.mxu1 %v4421_v50  ;;  %v3945_v20 = vpack.i.bf16 %v5080_v13, %v5078_v5  ;;  %v3935_v4 = vpack.i.bf16 %v1534_v15, %v1533_v53 }
 0x17f   : > { %3896 = vrot.lane.b32.xlu0 %v3895_v24, %s4426_s9  ;;  %3881 = vrot.lane.b32.xlu1 %v3895_v24, %s4423_s17  ;;  %v3672_v32 = vpop.f32.mrf.mxu0  ;;  %v5089_v24 = vld [vmem:[#allocation2 + $0xda] sm:$0xff] }
 0x180   : > { %1477 = vst.msk [vmem:[#allocation2 + $0x151] sm:$0xff] %vm1394_vm1, %v1388_v26  ;;  %v1391_v29 = vadd.f32 %v3672_v32, %v1019_v30  ;;  %3708 = vmatpush1.msra.mxu1 %v2899_v37  ;;  %3038 = vmatprep.subr.mxu0 %v4421_v50  ;;  %v3940_v14 = vpack.i.bf16 %v1566_v27, %v5089_v24  ;;  %v1630_v30 = vld [vmem:[#allocation2 + $0xf9] sm:$0xff]  ;;  %v1539_v27 = vld [vmem:[#allocation2 + $0x121] sm:$0xff] }
 0x181   : > { %v1343_v42 = vpop.f32.mrf.mxu0  ;;  %3691 = vmatprep.subr.mxu1 %v4421_v50  ;;  %3039 = vmatpush1.msra.mxu0 %v2900_v0  ;;  %v3975_v26 = vpack.i.bf16 %v1662_v3, %v4786_v35  ;;  %v3970_v32 = vpack.i.bf16 %v1630_v30, %v4792_v40  ;;  %v3980_v21 = vpack.i.bf16 %v1630_v30, %v1535_v31  ;;  %v1727_v0 = vld [vmem:[#allocation2 + $0x111] sm:$0xff]  ;;  %v1571_v30 = vld [vmem:[#allocation2 + $0x122] sm:$0xff] }
 0x182   : > { %1480 = vst.msk [vmem:[#allocation2 + $0x171] sm:$0xff] %vm1394_vm1, %v1391_v29  ;;  %v1390_v44 = vadd.f32 %v1343_v42, %v1018_v7  ;;  %3709 = vmatpush1.msra.mxu1 %v2898_v62  ;;  %3040 = vmatprep.subr.mxu0 %v4421_v50  ;;  %v1597_v29 = vld [vmem:[#allocation2 + $0xf0] sm:$0xff]  ;;  %v1598_v7 = vld [vmem:[#allocation2 + $0xf8] sm:$0xff]  ;;  %v4005_v35 = vpack.i.bf16 %v1535_v31, %v4790_v39 }
 0x183   : > { %3891 = vrot.lane.b32.xlu1 %v3875_v60, %s4427_s21  ;;  %3901 = vrot.lane.b32.xlu0 %v3900_v41, %s4422_s13  ;;  %v3675_v52 = vpop.f32.mrf.mxu0  ;;  %v3905_v60 = vpack.i.bf16 %v5045_v61, %v4954_v51  ;;  %v2915_v51 = vld [vmem:[%s5855_s5 + $0x88] sm:$0xff]  ;;  %v1600_v39 = vld [vmem:[#allocation2 + $0x110] sm:$0xff] }
 0x184   : > { %1479 = vst.msk [vmem:[#allocation2 + $0x169] sm:$0xff] %vm1394_vm1, %v1390_v44  ;;  %v1393_v63 = vadd.f32 %v3675_v52, %v1037_v48  ;;  %3692 = vmatprep.subr.mxu1 %v4421_v50  ;;  %3041 = vmatpush1.msra.mxu0 %v2899_v37  ;;  %v4015_v44 = vpack.i.bf16 %v1727_v0, %v4811_v57  ;;  %v1664_v48 = vld [vmem:[#allocation2 + $0x112] sm:$0xff]  ;;  %v1537_v52 = vld [vmem:[#allocation2 + $0x109] sm:$0xff] }
 0x185   : > { %v1353_v12 = vpop.f32.mrf.mxu0  ;;  %3710 = vmatpush2.msra.mxu1 %v2915_v51  ;;  %3042 = vmatprep.subr.mxu0 %v4421_v50 }
 0x186   : > { %1482 = vst.msk [vmem:[#allocation2 + $0x189] sm:$0xff] %vm1394_vm1, %v1393_v63  ;;  %v1392_v22 = vadd.f32 %v1353_v12, %v1036_v19  ;;  %3693 = vmatprep.subr.mxu1 %v4421_v50  ;;  %3043 = vmatpush1.msra.mxu0 %v2898_v62  ;;  %v4025_v63 = vpack.i.bf16 %v1664_v48, %v4826_v10 }
 0x187   : > { %3911 = vrot.lane.b32.xlu1 %v3910_v6, %s4425_s19  ;;  %3906 = vrot.lane.b32.xlu0 %v3905_v60, %s4423_s17  ;;  %v4030_v19 = vpack.i.bf16 %v1727_v0, %v1537_v52  ;;  %v4050_v12 = vpack.i.bf16 %v1537_v52, %v4809_v56 }
 0x188   : > { %1481 = vst.msk [vmem:[#allocation2 + $0x181] sm:$0xff] %vm1394_vm1, %v1392_v22  ;;  %3711 = vmatpush2.msra.mxu1 %v2914_v8  ;;  %3072 = vmatprep.subr.mxu0 %v4421_v50 }
 0x189   : > { %3073 = vmatpush2.msra.mxu0 %v2915_v51  ;;  %v4055_v51 = vpack.i.bf16 %v1600_v39, %v4820_v2  ;;  %v1601_v2 = vld [vmem:[#allocation2 + $0x120] sm:$0xff] }
 0x18a   : > { %3074 = vmatprep.subr.mxu0 %v4421_v50  ;;  %v3990_v50 = vpack.i.bf16 %v1598_v7, %v1597_v29 }
 0x18b   : > { %3916 = vrot.lane.b32.xlu1 %v3910_v6, %s4424_s18  ;;  %3921 = vrot.lane.b32.xlu0 %v3900_v41, %s4428_s29  ;;  %v1599_v6 = vld [vmem:[#allocation2 + $0x108] sm:$0xff] }
 0x18c   : > { %3075 = vmatpush2.msra.mxu0 %v2914_v8  ;;  %v4040_v37 = vpack.i.bf16 %v1600_v39, %v1599_v6  ;;  %v4045_v10 = vpack.i.bf16 %v1599_v6, %v4818_v1  ;;  %v1729_v8 = vld [vmem:[#allocation2 + $0x129] sm:$0xff]  ;;  %v1573_v6 = vld [vmem:[#allocation2 + $0x13a] sm:$0xff] }
 0x18d   : > { %v4070_v56 = vpack.i.bf16 %v1729_v8, %v4850_v25  ;;  %v1666_v1 = vld [vmem:[#allocation2 + $0x12a] sm:$0xff]  ;;  %v1603_v39 = vld [vmem:[#allocation2 + $0x138] sm:$0xff] }
 0x18f   : > { %3926 = vrot.lane.b32.xlu1 %v3900_v41, %s4427_s21  ;;  %3931 = vrot.lane.b32.xlu0 %v3905_v60, %s4426_s9  ;;  %v1567_v41 = vld [vmem:[#allocation2 + $0xf2] sm:$0xff]  ;;  %v1569_v60 = vld [vmem:[#allocation2 + $0x10a] sm:$0xff] }
 0x190   : > { %v3985_v42 = vpack.i.bf16 %v1662_v3, %v1567_v41  ;;  %v4010_v40 = vpack.i.bf16 %v1567_v41, %v4788_v38  ;;  %v5122_v38 = vpop.permute.xlu0 %3776  ;;  %v4035_v57 = vpack.i.bf16 %v1664_v48, %v1569_v60  ;;  %v4065_v62 = vpack.i.bf16 %v1569_v60, %v4807_v55  ;;  %v1668_v48 = vld [vmem:[#allocation2 + $0x142] sm:$0xff] }
 0x191   : > { %v4080_v55 = vpack.i.bf16 %v1666_v1, %v4877_v45  ;;  %v1604_v60 = vld [vmem:[#allocation2 + $0x140] sm:$0xff] }
 0x193   : > { %3946 = vrot.lane.b32.xlu0 %v3945_v20, %s4425_s19  ;;  %3936 = vrot.lane.b32.xlu1 %v3935_v4, %s4422_s13 }
 0x194   : > { %v5128_v22 = vpop.permute.xlu0 %3781 }
 0x197   : > { %3956 = vrot.lane.b32.xlu0 %v3935_v4, %s4428_s29  ;;  %3941 = vrot.lane.b32.xlu1 %v3940_v14, %s4423_s17 }
 0x198   : > { %v5136_v53 = vpop.permute.xlu0 %2504 }
 0x19b   : > { %3966 = vrot.lane.b32.xlu0 %v3940_v14, %s4426_s9  ;;  %3951 = vrot.lane.b32.xlu1 %v3945_v20, %s4424_s18 }
 0x19f   : > { %3961 = vrot.lane.b32.xlu1 %v3935_v4, %s4427_s21  ;;  %3976 = vrot.lane.b32.xlu0 %v3975_v26, %s4426_s9  ;;  %v1602_v4 = vld [vmem:[#allocation2 + $0x128] sm:$0xff]  ;;  %v4085_v26 = vpack.i.bf16 %v1729_v8, %v1539_v27 }
 0x1a0   : > { %v4095_v3 = vpack.i.bf16 %v1602_v4, %v1601_v2  ;;  %v4110_v41 = vpack.i.bf16 %v1602_v4, %v4836_v17  ;;  %v1617_v4 = vld [vmem:[#allocation2 + $0x61] sm:$0xff] }
 0x1a3   : > { %3971 = vrot.lane.b32.xlu1 %v3970_v32, %s4427_s21  ;;  %3981 = vrot.lane.b32.xlu0 %v3980_v21, %s4422_s13  ;;  %v4100_v32 = vpack.i.bf16 %v1601_v2, %v4834_v16  ;;  %v1638_v2 = vld [vmem:[#allocation2 + $0x159] sm:$0xff] }
 0x1a7   : > { %3991 = vrot.lane.b32.xlu1 %v3990_v50, %s4425_s19  ;;  %3986 = vrot.lane.b32.xlu0 %v3985_v42, %s4423_s17 }
 0x1ab   : > { %3996 = vrot.lane.b32.xlu1 %v3990_v50, %s4424_s18  ;;  %4001 = vrot.lane.b32.xlu0 %v3980_v21, %s4428_s29  ;;  %v4090_v21 = vpack.i.bf16 %v1666_v1, %v1571_v30  ;;  %v4105_v50 = vpack.i.bf16 %v1539_v27, %v4838_v18  ;;  %v4165_v1 = vpack.i.bf16 %v1604_v60, %v4893_v58 }
 0x1af   : > { %4006 = vrot.lane.b32.xlu1 %v4005_v35, %s4427_s21  ;;  %4011 = vrot.lane.b32.xlu0 %v4010_v40, %s4426_s9  ;;  %v4120_v35 = vpack.i.bf16 %v1571_v30, %v4863_v33  ;;  %v1636_v40 = vld [vmem:[#allocation2 + $0x141] sm:$0xff] }
 0x1b0   : > { %v4130_v18 = vpack.i.bf16 %v1636_v40, %v4879_v46 }
 0x1b3   : > { %4016 = vrot.lane.b32.xlu0 %v4015_v44, %s4428_s29  ;;  %4021 = vrot.lane.b32.xlu1 %v4015_v44, %s4427_s21  ;;  %v1541_v44 = vld [vmem:[#allocation2 + $0x139] sm:$0xff] }
 0x1b4   : > { %v4170_v27 = vpack.i.bf16 %v1541_v44, %v1617_v4 }
 0x1b7   : > { %4026 = vrot.lane.b32.xlu0 %v4025_v63, %s4426_s9  ;;  %4031 = vrot.lane.b32.xlu1 %v4030_v19, %s4422_s13  ;;  %v4140_v63 = vpack.i.bf16 %v1636_v40, %v1541_v44  ;;  %v4135_v19 = vpack.i.bf16 %v1668_v48, %v4912_v9  ;;  %v4155_v9 = vpack.i.bf16 %v1603_v39, %v4891_v54 }
 0x1bb   : > { %4041 = vrot.lane.b32.xlu0 %v4040_v37, %s4425_s19  ;;  %4036 = vrot.lane.b32.xlu1 %v4035_v57, %s4423_s17  ;;  %v4145_v57 = vpack.i.bf16 %v1668_v48, %v1573_v6 }
 0x1bf   : > { %4051 = vrot.lane.b32.xlu0 %v4050_v12, %s4428_s29  ;;  %4046 = vrot.lane.b32.xlu1 %v4045_v10, %s4424_s18 }
 0x1c3   : > { %4066 = vrot.lane.b32.xlu0 %v4065_v62, %s4426_s9  ;;  %4056 = vrot.lane.b32.xlu1 %v4055_v51, %s4424_s18  ;;  %v4160_v51 = vpack.i.bf16 %v1541_v44, %v4865_v34  ;;  %v1652_v44 = vld [vmem:[#allocation2 + $0x82] sm:$0xff] }
 0x1c7   : > { %4061 = vrot.lane.b32.xlu1 %v4050_v12, %s4427_s21  ;;  %4071 = vrot.lane.b32.xlu0 %v4070_v56, %s4428_s29  ;;  %v4150_v12 = vpack.i.bf16 %v1604_v60, %v1603_v39 }
 0x1c8   : > { %v5141_v15 = vpop.permute.xlu1 %3791 }
 0x1c9   : > { %v5143_v20 = vpop.permute.xlu0 %3786 }
 0x1cb   : > { %4081 = vrot.lane.b32.xlu0 %v4080_v55, %s4426_s9  ;;  %4076 = vrot.lane.b32.xlu1 %v4070_v56, %s4427_s21  ;;  %v4175_v55 = vpack.i.bf16 %v1573_v6, %v4895_v59 }
 0x1cd   : > { %v5148_v14 = vpop.permute.xlu0 %3796  ;;  %v5150_v25 = vpop.permute.xlu1 %3801 }
 0x1cf   : > { %4096 = vrot.lane.b32.xlu1 %v4095_v3, %s4425_s19  ;;  %4086 = vrot.lane.b32.xlu0 %v4085_v26, %s4422_s13  ;;  %v4185_v3 = vpack.i.bf16 %v1638_v2, %v4930_v23  ;;  %v1543_v26 = vld [vmem:[#allocation2 + $0x151] sm:$0xff] }
 0x1d1   : > { %v5154_v31 = vpop.permute.xlu0 %3806  ;;  %v5156_v45 = vpop.permute.xlu1 %3811 }
 0x1d3   : > { %4101 = vrot.lane.b32.xlu1 %v4100_v32, %s4424_s18  ;;  %4091 = vrot.lane.b32.xlu0 %v4090_v21, %s4423_s17  ;;  %v4195_v32 = vpack.i.bf16 %v1638_v2, %v1543_v26 }
 0x1d5   : > { %v5161_v29 = vpop.permute.xlu0 %3826  ;;  %v5163_v7 = vpop.permute.xlu1 %3816 }
 0x1d7   : > { %4111 = vrot.lane.b32.xlu1 %v4110_v41, %s4424_s18  ;;  %4106 = vrot.lane.b32.xlu0 %v4105_v50, %s4428_s29  ;;  %v1670_v41 = vld [vmem:[#allocation2 + $0x15a] sm:$0xff] }
 0x1d8   : > { %v4190_v39 = vpack.i.bf16 %v1670_v41, %v1652_v44 }
 0x1d9   : > { %v5169_v42 = vpop.permute.xlu1 %3821  ;;  %v5171_v16 = vpop.permute.xlu0 %3831 }
 0x1db   : > { %4116 = vrot.lane.b32.xlu1 %v4105_v50, %s4427_s21  ;;  %4121 = vrot.lane.b32.xlu0 %v4120_v35, %s4426_s9  ;;  %v5215_v50 = vld [vmem:[#allocation2 + $0x152] sm:$0xff] }
 0x1dc   : > { %v4200_v60 = vpack.i.bf16 %v1670_v41, %v5215_v50  ;;  %v1701_v41 = vld [vmem:[#allocation2 + $0x158] sm:$0xff] }
 0x1dd   : > { %v5176_v0 = vpop.permute.xlu1 %3841  ;;  %v5178_v17 = vpop.permute.xlu0 %3836 }
 0x1df   : > { %4131 = vrot.lane.b32.xlu1 %v4130_v18, %s4427_s21  ;;  %4126 = vrot.lane.b32.xlu0 %v4130_v18, %s4428_s29 }
 0x1e1   : > { %v5183_v52 = vpop.permute.xlu0 %3856  ;;  %v5185_v33 = vpop.permute.xlu1 %3846 }
 0x1e3   : > { %4141 = vrot.lane.b32.xlu1 %v4140_v63, %s4422_s13  ;;  %4136 = vrot.lane.b32.xlu0 %v4135_v19, %s4426_s9 }
 0x1e5   : > { %v5190_v46 = vpop.permute.xlu1 %3851  ;;  %v3862_v37 = vpop.permute.xlu0 %3861 }
 0x1e6   : > { %v3863_v58 = vunpack.i.l.bf16 %v3862_v37  ;;  %v3864_v35 = vunpack.i.h.bf16 %v3862_v37 }
 0x1e7   : > { %4146 = vrot.lane.b32.xlu1 %v4145_v57, %s4423_s17  ;;  %4151 = vrot.lane.b32.xlu0 %v4150_v12, %s4425_s19  ;;  %v1700_v12 = vld [vmem:[#allocation2 + $0x150] sm:$0xff] }
 0x1e8   : > { %v2680_v48 = vsel %vm1394_vm1, %v4960_v11, %v3863_v58 }
 0x1e9   : > { %v5194_v10 = vpop.permute.xlu1 %3871  ;;  %v3867_v62 = vpop.permute.xlu0 %3866 }
 0x1ea   : > { %v3868_v21 = vunpack.i.l.bf16 %v3867_v62  ;;  %v3869_v23 = vunpack.i.h.bf16 %v3867_v62  ;;  %v2681_v62 = vsel %vm1394_vm1, %v4963_v49, %v3864_v35 }
 0x1eb   : > { %4156 = vrot.lane.b32.xlu1 %v4155_v9, %s4424_s18  ;;  %4161 = vrot.lane.b32.xlu0 %v4160_v51, %s4428_s29 }
 0x1ec   : > { %v2713_v37 = vsel %vm2700_vm3, %v2680_v48, %v3868_v21  ;;  %v2714_v11 = vsel %vm2700_vm3, %v2681_v62, %v3869_v23 }
 0x1ed   : > { %v3887_v8 = vpop.permute.xlu0 %3886  ;;  %v5200_v56 = vpop.permute.xlu1 %3876 }
 0x1ee   : > { %v3888_v40 = vunpack.i.l.bf16 %v3887_v8  ;;  %v3889_v63 = vunpack.i.h.bf16 %v3887_v8  ;;  %v1682_v8 = vld [vmem:[#allocation2 + $0x78] sm:$0xff]  ;;  %v3878_v62 = vunpack.i.l.bf16 %v5200_v56 }
 0x1ef   : > { %4166 = vrot.lane.b32.xlu1 %v4165_v1, %s4424_s18  ;;  %4176 = vrot.lane.b32.xlu0 %v4175_v55, %s4426_s9  ;;  %v1714_v1 = vld [vmem:[#allocation2 + $0x79] sm:$0xff] }
 0x1f0   : > { %v2746_v9 = vsel %vm2733_vm5, %v2713_v37, %v3888_v40  ;;  %v2747_v55 = vsel %vm2733_vm5, %v2714_v11, %v3889_v63 }
 0x1f1   : > { %v5206_v54 = vpop.permute.xlu0 %3896  ;;  %v5208_v34 = vpop.permute.xlu1 %3881 }
 0x1f2   : > { %v3898_v2 = vunpack.i.l.bf16 %v5206_v54  ;;  %v3899_v35 = vunpack.i.h.bf16 %v5206_v54  ;;  %v4220_v54 = vpack.i.bf16 %v1701_v41, %v1700_v12 }
 0x1f3   : > { %4171 = vrot.lane.b32.xlu1 %v4170_v27, %s4427_s21  ;;  %4186 = vrot.lane.b32.xlu0 %v4185_v3, %s4427_s21  ;;  %v4205_v27 = vpack.i.bf16 %v1700_v12, %v1682_v8  ;;  %v3883_v8 = vunpack.i.l.bf16 %v5208_v34 }
 0x1f5   : > { %v3892_v59 = vpop.permute.xlu1 %3891  ;;  %v5213_v30 = vpop.permute.xlu0 %3901 }
 0x1f6   : > { %v3893_v18 = vunpack.i.l.bf16 %v3892_v59  ;;  %v3894_v57 = vunpack.i.h.bf16 %v3892_v59 }
 0x1f7   : > { %4181 = vrot.lane.b32.xlu1 %v4185_v3, %s4428_s29  ;;  %4196 = vrot.lane.b32.xlu0 %v4195_v32, %s4422_s13  ;;  %v4210_v3 = vpack.i.bf16 %v1543_v26, %v1714_v1  ;;  %v3879_v1 = vunpack.i.h.bf16 %v5200_v56 }
 0x1f8   : > { %v2779_v51 = vsel %vm2766_vm4, %v2746_v9, %v3893_v18  ;;  %v2780_v58 = vsel %vm2766_vm4, %v2747_v55, %v3894_v57  ;;  %v1683_v18 = vld [vmem:[#allocation2 + $0x80] sm:$0xff] }
 0x1f9   : > { %v5221_v19 = vpop.permute.xlu1 %3911  ;;  %v5223_v6 = vpop.permute.xlu0 %3906  ;;  %v2812_v40 = vsel %vm2799_vm6, %v2779_v51, %v3898_v2  ;;  %v5251_v57 = vld [vmem:[#allocation2 + $0x7a] sm:$0xff]  ;;  %v3884_v2 = vunpack.i.h.bf16 %v5208_v34  ;;  %v2683_v34 = vsel %vm1394_vm1, %v4986_v36, %v3879_v1 }
 0x1fa   : > { %v4230_v12 = vpack.i.bf16 %v5215_v50, %v5251_v57  ;;  %v3913_v55 = vunpack.i.l.bf16 %v5221_v19 }
 0x1fb   : > { %4191 = vrot.lane.b32.xlu1 %v4190_v39, %s4426_s9  ;;  %4201 = vrot.lane.b32.xlu0 %v4200_v60, %s4423_s17  ;;  %v4215_v39 = vpack.i.bf16 %v1701_v41, %v1683_v18  ;;  %v2813_v60 = vsel %vm2799_vm6, %v2780_v58, %v3899_v35  ;;  %v3914_v58 = vunpack.i.h.bf16 %v5221_v19  ;;  %v1545_v41 = vld [vmem:[#allocation2 + $0x169] sm:$0xff]  ;;  %v2716_v19 = vsel %vm2700_vm3, %v2683_v34, %v3884_v2  ;;  %v1716_v34 = vld [vmem:[#allocation2 + $0x91] sm:$0xff] }
 0x1fc   : > { %v1684_v2 = vld [vmem:[#allocation2 + $0x90] sm:$0xff] }
 0x1fd   : > { %v3917_v49 = vpop.permute.xlu1 %3916  ;;  %v3922_v4 = vpop.permute.xlu0 %3921 }
 0x1fe   : > { %v3919_v59 = vunpack.i.h.bf16 %v3917_v49  ;;  %v3918_v32 = vunpack.i.l.bf16 %v3917_v49  ;;  %v3923_v21 = vunpack.i.l.bf16 %v3922_v4  ;;  %v3924_v44 = vunpack.i.h.bf16 %v3922_v4  ;;  %v1622_v4 = vld [vmem:[#allocation2 + $0x99] sm:$0xff] }
 0x1ff   : > { %4206 = vrot.lane.b32.xlu1 %v4205_v27, %s4424_s18  ;;  %4211 = vrot.lane.b32.xlu0 %v4210_v3, %s4428_s29  ;;  %v2682_v27 = vsel %vm1394_vm1, %v4984_v28, %v3878_v62  ;;  %v1672_v28 = vld [vmem:[#allocation2 + $0x172] sm:$0xff]  ;;  %v5291_v62 = vld [vmem:[#allocation2 + $0x16a] sm:$0xff] }
 0x200   : > { %v2845_v23 = vsel %vm2832_vm7, %v2812_v40, %v3918_v32  ;;  %v2846_v37 = vsel %vm2832_vm7, %v2813_v60, %v3919_v59 }
 0x201   : > { %v3927_v48 = vpop.permute.xlu1 %3926  ;;  %v5242_v26 = vpop.permute.xlu0 %3931  ;;  %v2878_v63 = vsel %vm2865_vm8, %v2845_v23, %v3923_v21  ;;  %v2879_v51 = vsel %vm2865_vm8, %v2846_v37, %v3924_v44  ;;  %v2715_v21 = vsel %vm2700_vm3, %v2682_v27, %v3883_v8  ;;  %v2749_v23 = vsel %vm2733_vm5, %v2716_v19, %v3914_v58  ;;  %v1755_v27 = vld [vmem:[#allocation2 + $0xe2] sm:$0xff] }
 0x202   : > { %3137 = vmatmul.mubr.f32.vlgmr.msra.gmra.mxu1 %v2878_v63  ;;  %v3928_v49 = vunpack.i.l.bf16 %v3927_v48  ;;  %v2748_v35 = vsel %vm2733_vm5, %v2715_v21, %v3913_v55  ;;  %v3934_v18 = vunpack.i.h.bf16 %v5242_v26 }
 0x203   : > { %3502 = vmatprep.mubr.msk.f32.mxu1 %vm1394_vm1, %v5045_v61  ;;  %4216 = vrot.lane.b32.xlu1 %v4215_v39, %s4424_s18  ;;  %v1640_v61 = vld [vmem:[#allocation2 + $0x171] sm:$0xff] }
 0x204   : > { %4221 = vrot.lane.b32.xlu0 %v4220_v54, %s4425_s19  ;;  %v4240_v32 = vpack.i.bf16 %v1640_v61, %v1622_v4  ;;  %v2781_v40 = vsel %vm2766_vm4, %v2748_v35, %v3928_v49  ;;  %v4250_v63 = vpack.i.bf16 %v1640_v61, %v1545_v41  ;;  %v4255_v49 = vpack.i.bf16 %v1672_v28, %v5291_v62 }
 0x205   : > { %v5254_v9 = vpop.permute.xlu0 %3946  ;;  %v5256_v11 = vpop.permute.xlu1 %3936  ;;  %v3903_v35 = vunpack.i.l.bf16 %v5213_v30 }
 0x206   : > { %3142 = vmatmul.mubr.f32.gmra.mxu1 %v2879_v51 }
 0x207   : > { %3503 = vmatprep.mubr.msk.f32.mxu1 %vm1394_vm1, %v5089_v24  ;;  %4231 = vrot.lane.b32.xlu1 %v4230_v12, %s4426_s9  ;;  %v3929_v24 = vunpack.i.h.bf16 %v3927_v48  ;;  %v5287_v48 = vld [vmem:[#allocation2 + $0x9a] sm:$0xff] }
 0x208   : > { %4226 = vrot.lane.b32.xlu0 %v4210_v3, %s4427_s21  ;;  %v3933_v3 = vunpack.i.l.bf16 %v5242_v26  ;;  %v4245_v37 = vpack.i.bf16 %v1672_v28, %v5287_v48  ;;  %v1702_v26 = vld [vmem:[#allocation2 + $0x168] sm:$0xff] }
 0x209   : > { %v3957_v59 = vpop.permute.xlu0 %3956  ;;  %v5272_v56 = vpop.permute.xlu1 %3941  ;;  %v2782_v39 = vsel %vm2766_vm4, %v2749_v23, %v3929_v24  ;;  %v4260_v58 = vpack.i.bf16 %v1702_v26, %v1684_v2  ;;  %v1703_v24 = vld [vmem:[#allocation2 + $0x170] sm:$0xff]  ;;  %v4265_v23 = vpack.i.bf16 %v1545_v41, %v1716_v34  ;;  %v2684_v41 = vsel %vm1394_vm1, %v5034_v47, %v3903_v35 }
 0x20a   : > { %v3958_v51 = vunpack.i.l.bf16 %v3957_v59  ;;  %v2814_v12 = vsel %vm2799_vm6, %v2781_v40, %v3933_v3  ;;  %v2815_v4 = vsel %vm2799_vm6, %v2782_v39, %v3934_v18  ;;  %v3959_v21 = vunpack.i.h.bf16 %v3957_v59  ;;  %v1685_v40 = vld [vmem:[#allocation2 + $0x98] sm:$0xff] }
 0x20b   : > { %4241 = vrot.lane.b32.xlu1 %v4240_v32, %s4427_s21  ;;  %v3908_v59 = vunpack.i.l.bf16 %v5223_v6  ;;  %v1756_v18 = vld [vmem:[#allocation2 + $0xf2] sm:$0xff]  ;;  %v3948_v39 = vunpack.i.l.bf16 %v5254_v9 }
 0x20c   : > { %4236 = vrot.lane.b32.xlu0 %v4240_v32, %s4428_s29 }
 0x20d   : > { %v5285_v44 = vpop.permute.xlu0 %3966  ;;  %v3952_v36 = vpop.permute.xlu1 %3951 }
 0x20e   : > { %v3954_v60 = vunpack.i.h.bf16 %v3952_v36  ;;  %v3953_v54 = vunpack.i.l.bf16 %v3952_v36  ;;  %v4270_v36 = vpack.i.bf16 %v1703_v24, %v1685_v40  ;;  %v1737_v40 = vld [vmem:[#allocation2 + $0x189] sm:$0xff] }
 0x20f   : > { %4251 = vrot.lane.b32.xlu1 %v4250_v63, %s4422_s13  ;;  %v3904_v63 = vunpack.i.h.bf16 %v5213_v30  ;;  %v5326_v30 = vld [vmem:[#allocation2 + $0x92] sm:$0xff] }
 0x210   : > { %4246 = vrot.lane.b32.xlu0 %v4245_v37, %s4426_s9  ;;  %v2847_v8 = vsel %vm2832_vm7, %v2814_v12, %v3953_v54  ;;  %v2848_v32 = vsel %vm2832_vm7, %v2815_v4, %v3954_v60  ;;  %v3909_v60 = vunpack.i.h.bf16 %v5223_v6  ;;  %v3949_v37 = vunpack.i.h.bf16 %v5254_v9 }
 0x211   : > { %v3962_v1 = vpop.permute.xlu1 %3961  ;;  %v5297_v61 = vpop.permute.xlu0 %3976  ;;  %v2880_v55 = vsel %vm2865_vm8, %v2847_v8, %v3958_v51  ;;  %v2881_v19 = vsel %vm2865_vm8, %v2848_v32, %v3959_v21  ;;  %v4275_v8 = vpack.i.bf16 %v1703_v24, %v1702_v26  ;;  %v4285_v6 = vpack.i.bf16 %v5291_v62, %v5326_v30  ;;  %v1718_v26 = vld [vmem:[#allocation2 + $0xa9] sm:$0xff] }
 0x212   : > { %3147 = vmatmul.mubr.f32.gmra.mxu1 %v2880_v55  ;;  %v3963_v54 = vunpack.i.l.bf16 %v3962_v1  ;;  %v2717_v55 = vsel %vm2700_vm3, %v2684_v41, %v3908_v59  ;;  %v3964_v2 = vunpack.i.h.bf16 %v3962_v1  ;;  %v2685_v4 = vsel %vm1394_vm1, %v5036_v43, %v3904_v63  ;;  %v1610_v63 = vld [vmem:[#allocation2 + $0x188] sm:$0xff] }
 0x213   : > { %3504 = vmatprep.mubr.msk.f32.mxu1 %vm1394_vm1, %v1755_v27  ;;  %4256 = vrot.lane.b32.xlu1 %v4255_v49, %s4423_s17  ;;  %v1736_v49 = vld [vmem:[#allocation2 + $0x181] sm:$0xff]  ;;  %v2750_v47 = vsel %vm2733_vm5, %v2717_v55, %v3948_v39  ;;  %v2718_v9 = vsel %vm2700_vm3, %v2685_v4, %v3909_v60  ;;  %v3969_v59 = vunpack.i.h.bf16 %v5285_v44  ;;  %v1719_v60 = vld [vmem:[#allocation2 + $0xb1] sm:$0xff] }
 0x214   : > { %4261 = vrot.lane.b32.xlu0 %v4260_v58, %s4424_s18  ;;  %v2783_v27 = vsel %vm2766_vm4, %v2750_v47, %v3963_v54  ;;  %v2751_v1 = vsel %vm2733_vm5, %v2718_v9, %v3949_v37  ;;  %v3968_v58 = vunpack.i.l.bf16 %v5285_v44  ;;  %v4300_v24 = vpack.i.bf16 %v1736_v49, %v1718_v26  ;;  %v1686_v4 = vld [vmem:[#allocation2 + $0xa8] sm:$0xff] }
 0x215   : > { %v5307_v3 = vpop.permute.xlu1 %3971  ;;  %v5309_v28 = vpop.permute.xlu0 %3981  ;;  %v2784_v43 = vsel %vm2766_vm4, %v2751_v1, %v3964_v2  ;;  %v4290_v55 = vpack.i.bf16 %v1737_v40, %v1719_v60  ;;  %v3778_v1 = vunpack.i.l.bf16 %v5122_v38  ;;  %v3939_v60 = vunpack.i.h.bf16 %v5256_v11 }
 0x216   : > { %3152 = vmatmul.mubr.f32.gmra.mxu1 %v2881_v19  ;;  %v2817_v44 = vsel %vm2799_vm6, %v2784_v43, %v3969_v59  ;;  %v3783_v43 = vunpack.i.l.bf16 %v5128_v22 }
 0x217   : > { %3505 = vmatprep.mubr.msk.f32.mxu1 %vm1394_vm1, %v1756_v18  ;;  %4266 = vrot.lane.b32.xlu1 %v4265_v23, %s4428_s29  ;;  %v2816_v18 = vsel %vm2799_vm6, %v2783_v27, %v3968_v58  ;;  %v1758_v58 = vld [vmem:[#allocation2 + $0x10a] sm:$0xff] }
 0x218   : > { %4271 = vrot.lane.b32.xlu0 %v4270_v36, %s4424_s18  ;;  %v1609_v36 = vld [vmem:[#allocation2 + $0x180] sm:$0xff] }
 0x219   : > { %v5322_v51 = vpop.permute.xlu1 %3991  ;;  %v5324_v12 = vpop.permute.xlu0 %3986  ;;  %v4310_v2 = vpack.i.bf16 %v1610_v63, %v1609_v36  ;;  %v4295_v26 = vpack.i.bf16 %v1609_v36, %v1686_v4  ;;  %v3943_v36 = vunpack.i.l.bf16 %v5272_v56 }
 0x21b   : > { %4276 = vrot.lane.b32.xlu1 %v4275_v8, %s4425_s19 }
 0x21c   : > { %4286 = vrot.lane.b32.xlu0 %v4285_v6, %s4426_s9 }
 0x21d   : > { %v3997_v32 = vpop.permute.xlu1 %3996  ;;  %v4002_v21 = vpop.permute.xlu0 %4001 }
 0x21e   : > { %v3999_v34 = vunpack.i.h.bf16 %v3997_v32  ;;  %v3998_v35 = vunpack.i.l.bf16 %v3997_v32  ;;  %v4003_v19 = vunpack.i.l.bf16 %v4002_v21  ;;  %v4004_v54 = vunpack.i.h.bf16 %v4002_v21  ;;  %v1483_v21 = vld [vmem:[#allocation2] sm:$0xff] }
 0x21f   : > { %4281 = vrot.lane.b32.xlu1 %v4265_v23, %s4427_s21  ;;  %v1757_v23 = vld [vmem:[#allocation2 + $0xfa] sm:$0xff]  ;;  %v4315_v32 = vpack.i.bf16 %v1737_v40, %v1736_v49  ;;  %v2668_v49 = vsel %vm1394_vm1, %v1483_v21, %v3778_v1  ;;  %v3798_v40 = vunpack.i.l.bf16 %v5148_v14  ;;  %v5398_v1 = vld [vmem:[#allocation2 + $0x182] sm:$0xff] }
 0x220   : > { %4301 = vrot.lane.b32.xlu0 %v4300_v24, %s4428_s29  ;;  %v2849_v39 = vsel %vm2832_vm7, %v2816_v18, %v3998_v35  ;;  %v2850_v6 = vsel %vm2832_vm7, %v2817_v44, %v3999_v34  ;;  %v1687_v24 = vld [vmem:[#allocation2 + $0xb0] sm:$0xff]  ;;  %v3938_v34 = vunpack.i.l.bf16 %v5256_v11  ;;  %v3779_v18 = vunpack.i.h.bf16 %v5122_v38 }
 0x221   : > { %v5346_v41 = vpop.permute.xlu1 %4006  ;;  %v5348_v37 = vpop.permute.xlu0 %4011  ;;  %v2882_v8 = vsel %vm2865_vm8, %v2849_v39, %v4003_v19  ;;  %v2883_v27 = vsel %vm2865_vm8, %v2850_v6, %v4004_v54  ;;  %v4305_v59 = vpack.i.bf16 %v1610_v63, %v1687_v24  ;;  %v1484_v39 = vld [vmem:[#allocation2 + $0x8] sm:$0xff]  ;;  %v3993_v54 = vunpack.i.l.bf16 %v5322_v51 }
 0x222   : > { %3157 = vmatmul.mubr.f32.gmra.mxu1 %v2882_v8  ;;  %v5377_v8 = vld [vmem:[#allocation2 + $0x18a] sm:$0xff]  ;;  %v3944_v63 = vunpack.i.h.bf16 %v5272_v56  ;;  %v4009_v38 = vunpack.i.h.bf16 %v5346_v41  ;;  %v4008_v44 = vunpack.i.l.bf16 %v5346_v41  ;;  %v2686_v11 = vsel %vm1394_vm1, %v5078_v5, %v3938_v34 }
 0x223   : > { %3506 = vmatprep.mubr.msk.f32.mxu1 %vm1394_vm1, %v1757_v23  ;;  %4291 = vrot.lane.b32.xlu1 %v4290_v55, %s4428_s29  ;;  %v3784_v55 = vunpack.i.h.bf16 %v5128_v22  ;;  %v2701_v23 = vsel %vm2700_vm3, %v2668_v49, %v3783_v43  ;;  %v1739_v22 = vld [vmem:[#allocation2 + $0x1a1] sm:$0xff]  ;;  %v2669_v56 = vsel %vm1394_vm1, %v1484_v39, %v3779_v18  ;;  %v2687_v5 = vsel %vm1394_vm1, %v5080_v13, %v3939_v60 }
 0x224   : > { %4311 = vrot.lane.b32.xlu0 %v4310_v2, %s4425_s19  ;;  %v3994_v2 = vunpack.i.h.bf16 %v5322_v51  ;;  %v2734_v41 = vsel %vm2733_vm5, %v2701_v23, %v3798_v40  ;;  %v4013_v21 = vunpack.i.l.bf16 %v5348_v37  ;;  %v3973_v24 = vunpack.i.l.bf16 %v5307_v3  ;;  %s4357_s19 = sshll.u32 %s4430_s28, 4  ;;  %s4358_s19 = int_to_ptr.vmem [resolvable:$false] %s4357_s19 }
 0x225   : > { %v5356_v47 = vpop.permute.xlu0 %4016  ;;  %v5358_v9 = vpop.permute.xlu1 %4021  ;;  %v2767_v43 = vsel %vm2766_vm4, %v2734_v41, %v4008_v44  ;;  %v2702_v13 = vsel %vm2700_vm3, %v2669_v56, %v3784_v55  ;;  %v3974_v18 = vunpack.i.h.bf16 %v5307_v3  ;;  %v3978_v56 = vunpack.i.l.bf16 %v5297_v61 }
 0x226   : > { %3162 = vmatmul.mubr.f32.gmra.mxu1 %v2883_v27  ;;  %v3799_v27 = vunpack.i.h.bf16 %v5148_v14  ;;  %v2720_v14 = vsel %vm2700_vm3, %v2687_v5, %v3944_v63  ;;  %v2800_v44 = vsel %vm2799_vm6, %v2767_v43, %v4013_v21  ;;  %v1707_v5 = vld [vmem:[#allocation2 + $0x1a0] sm:$0xff]  ;;  %v4018_v43 = vunpack.i.l.bf16 %v5356_v47 }
 0x227   : > { %3507 = vmatprep.mubr.msk.f32.mxu1 %vm1394_vm1, %v1758_v58  ;;  %4296 = vrot.lane.b32.xlu1 %v4295_v26, %s4424_s18  ;;  %v2719_v26 = vsel %vm2700_vm3, %v2686_v11, %v3943_v36  ;;  %v4429_v58 = vmov 0   ;;  %v3301_v36 = vld [vmem:[%s5856_s6] sm:$0xff] }
 0x228   : > { %4316 = vrot.lane.b32.xlu0 %v4315_v32, %s4427_s21  ;;  %v2752_v51 = vsel %vm2733_vm5, %v2719_v26, %v3993_v54  ;;  %v4014_v32 = vunpack.i.h.bf16 %v5348_v37  ;;  %v2753_v37 = vsel %vm2733_vm5, %v2720_v14, %v3994_v2  ;;  %v1741_v21 = vld [vmem:[#allocation2 + $0x3a] sm:$0xff]  ;;  %v1759_v14 = vld [vmem:[#allocation2 + $0x112] sm:$0xff]  ;;  %s298_s21 = sand.u32 1, %s4409_s25  }
 0x229   : > { %v5367_v35 = vpop.permute.xlu0 %4026  ;;  %v5369_v19 = vpop.permute.xlu1 %4031  ;;  %4320 = vset.pattern.permute.xlu0 %v4429_v58  ;;  %v2785_v34 = vsel %vm2766_vm4, %v2752_v51, %v4009_v38  ;;  %v2735_v38 = vsel %vm2733_vm5, %v2702_v13, %v3799_v27  ;;  %v2786_v2 = vsel %vm2766_vm4, %v2753_v37, %v3974_v18  ;;  %s3435_s22 = sshll.u32 %s298_s21, 5  ;;  %s5809_s20 = scalar_lea.sflag [#allocation4], %s298_s21 }
 0x22a   : > { %v2818_v3 = vsel %vm2799_vm6, %v2785_v34, %v4014_v32  ;;  %v2768_v55 = vsel %vm2766_vm4, %v2735_v38, %v3973_v24  ;;  %v4019_v24 = vunpack.i.h.bf16 %v5356_v47  ;;  %v3793_v38 = vunpack.i.l.bf16 %v5141_v15  ;;  %s300_s23 = scalar_lea.vmem [#allocation6], %s3435_s22 }
 0x22b   : > { %4306 = vrot.lane.b32.xlu1 %v4305_v59, %s4424_s18  ;;  %v1738_v59 = vld [vmem:[#allocation2 + $0x199] sm:$0xff]  ;;  %s3343_s8 = sshll.u32 %s300_s23, 4  ;;  %s5802_s8 = int_to_ptr.vmem [resolvable:$true] %s3343_s8 }
 0x22c   : > { %2378 = vrot.lane.b32.xlu0 %v5377_v8, %s4426_s9  ;;  %s4353_s17 = scalar_lea.vmem %s5802_s8, 512  ;;  %p4360_p13 = scmp.lt.s32.totalorder %s5802_s8, %s4358_s19 }
 0x22d   : > { %v5390_v6 = vpop.permute.xlu0 %4041  ;;  %v5392_v4 = vpop.permute.xlu1 %4036  ;;  %p4354_p9 = scmp.ne.s32.totalorder %s5802_s8, %s4353_s17 }
 0x22f   : > { %2376 = vrot.lane.b32.xlu1 %v5398_v1, %s4426_s9  ;;  %p4355_p10 = pnand %p4354_p9, %p4510_p5 }
 0x230   : > { %2634 = vrot.lane.b32.xlu0 %v1739_v22, %s4428_s29  ;;  %v3979_v22 = vunpack.i.h.bf16 %v5297_v61  ;;  %v2801_v61 = vsel %vm2799_vm6, %v2768_v55, %v3978_v56  ;;  %v4323_v55 = vld [vmem:[#allocation2 + $0x18] sm:$0xff]  ;;  %v3813_v56 = vunpack.i.l.bf16 %v5156_v45 }
 0x231   : > { %v4052_v49 = vpop.permute.xlu0 %4051  ;;  %v4047_v40 = vpop.permute.xlu1 %4046  ;;  %p4356_p12 = pneg %p4355_p10 }
 0x232   : > { %v4054_v39 = vunpack.i.h.bf16 %v4052_v49  ;;  %v4053_v60 = vunpack.i.l.bf16 %v4052_v49  ;;  %v4049_v54 = vunpack.i.h.bf16 %v4047_v40  ;;  %v4048_v63 = vunpack.i.l.bf16 %v4047_v40  ;;  %v1742_v40 = vld [vmem:[#allocation2 + $0x4a] sm:$0xff] }
 0x233   : > { %2632 = vrot.lane.b32.xlu1 %v1738_v59, %s4428_s29  ;;  %v2819_v34 = vsel %vm2799_vm6, %v2786_v2, %v3979_v22  ;;  %v3988_v2 = vunpack.i.l.bf16 %v5324_v12  ;;  %v4324_v22 = vld [vmem:[#allocation2 + $0x20] sm:$0xff] }
 0x234   : > { %v2833_v23 = vsel %vm2832_vm7, %v2800_v44, %v4048_v63  ;;  %v2851_v11 = vsel %vm2832_vm7, %v2818_v3, %v4049_v54  ;;  %3305 = vperm.xlu0 %4320, %v3301_v36   ;;  %v1760_v36 = vld [vmem:[#allocation2 + $0x122] sm:$0xff]  ;;  %v3983_v44 = vunpack.i.l.bf16 %v5309_v28  ;;  %v3794_v3 = vunpack.i.h.bf16 %v5141_v15  ;;  %v1503_v15 = vld [vmem:[#allocation2 + $0xf0] sm:$0xff] }
 0x235   : > { %v5428_v27 = vpop.permute.xlu0 %4066  ;;  %v4057_v41 = vpop.permute.xlu1 %4056  ;;  %v2866_v26 = vsel %vm2865_vm8, %v2833_v23, %v4053_v60  ;;  %v2884_v58 = vsel %vm2865_vm8, %v2851_v11, %v4054_v39  ;;  %v3788_v39 = vunpack.i.l.bf16 %v5143_v20  ;;  %v3789_v60 = vunpack.i.h.bf16 %v5143_v20 }
 0x236   : > { %v4059_v51 = vunpack.i.h.bf16 %v4057_v41  ;;  %v4058_v32 = vunpack.i.l.bf16 %v4057_v41  ;;  %3077 = vmatmul.mubr.f32.vlgmr.msra.gmra.mxu0 %v2866_v26  ;;  %3167 = vmatmul.mubr.f32.gmra.mxu1 %v2884_v58  ;;  %v3984_v11 = vunpack.i.h.bf16 %v5309_v28  ;;  %v3989_v41 = vunpack.i.h.bf16 %v5324_v12 }
 0x237   : > { %3490 = vmatprep.mubr.msk.f32.mxu0 %vm1394_vm1, %v1741_v21  ;;  %3508 = vmatprep.mubr.msk.f32.mxu1 %vm1394_vm1, %v1759_v14  ;;  %v2670_v23 = vsel %vm1394_vm1, %v4323_v55, %v3788_v39  ;;  %v2671_v20 = vsel %vm1394_vm1, %v4324_v22, %v3789_v60  ;;  %v4043_v26 = vunpack.i.l.bf16 %v5390_v6  ;;  %v1504_v14 = vld [vmem:[#allocation2 + $0xf8] sm:$0xff]  ;;  %v3814_v12 = vunpack.i.h.bf16 %v5156_v45 }
 0x238   : > { %2506 = vrot.lane.b32.xlu1 %v1707_v5, %s4424_s18  ;;  %v2834_v59 = vsel %vm2832_vm7, %v2801_v61, %v4058_v32  ;;  %v2852_v13 = vsel %vm2832_vm7, %v2819_v34, %v4059_v51  ;;  %v4044_v51 = vunpack.i.h.bf16 %v5390_v6  ;;  %v2703_v21 = vsel %vm2700_vm3, %v2670_v23, %v3793_v38  ;;  %s4359_s18 = scalar_lea.vmem %s4358_s19, 1024 }
 0x239   : > { %v4062_v18 = vpop.permute.xlu1 %4061  ;;  %v5441_v37 = vpop.permute.xlu0 %4071  ;;  %v2867_v49 = vsel %vm2865_vm8, %v2834_v59, %v4018_v43  ;;  %v2885_v47 = vsel %vm2865_vm8, %v2852_v13, %v4019_v24  ;;  %v2688_v24 = vsel %vm1394_vm1, %v1503_v15, %v3983_v44  ;;  %v2704_v43 = vsel %vm2700_vm3, %v2671_v20, %v3794_v3  ;;  %v3302_v59 = vld [vmem:[%s5856_s6 + $0x8] sm:$0xff]  ;;  %p4361_p0 = scmp.lt.s32.totalorder %s4359_s18, %s4353_s17 }
 0x23a   : > { %3082 = vmatmul.mubr.f32.gmra.mxu0 %v2867_v49  ;;  %3172 = vmatmul.mubr.f32.gmra.mxu1 %v2885_v47  ;;  %v4064_v32 = vunpack.i.h.bf16 %v4062_v18  ;;  %v4063_v28 = vunpack.i.l.bf16 %v4062_v18  ;;  %v2689_v61 = vsel %vm1394_vm1, %v1504_v14, %v3984_v11  ;;  %v2721_v34 = vsel %vm2700_vm3, %v2688_v24, %v3988_v2 }
 0x23b   : > { %3491 = vmatprep.mubr.msk.f32.mxu0 %vm1394_vm1, %v1742_v40  ;;  %3509 = vmatprep.mubr.msk.f32.mxu1 %vm1394_vm1, %v1760_v36  ;;  %v2736_v6 = vsel %vm2733_vm5, %v2703_v21, %v3813_v56  ;;  %v2722_v13 = vsel %vm2700_vm3, %v2689_v61, %v3989_v41  ;;  %v4024_v18 = vunpack.i.h.bf16 %v5358_v9  ;;  %v2754_v49 = vsel %vm2733_vm5, %v2721_v34, %v4043_v26  ;;  %v1743_v34 = vld [vmem:[#allocation2 + $0x52] sm:$0xff]  ;;  %p4362_p1 = por %p4361_p0, %p4360_p13 }
 0x23c   : > { %3310 = vperm.xlu0 %4320, %v3302_v59   ;;  %v4023_v45 = vunpack.i.l.bf16 %v5358_v9  ;;  %v2755_v36 = vsel %vm2733_vm5, %v2722_v13, %v4044_v51  ;;  %v2787_v39 = vsel %vm2766_vm4, %v2754_v49, %v4064_v32  ;;  %v2769_v60 = vsel %vm2766_vm4, %v2736_v6, %v4063_v28  ;;  %v1761_v59 = vld [vmem:[#allocation2 + $0x12a] sm:$0xff] }
 0x23d   : > { %v5449_v54 = vpop.permute.xlu0 %4081  ;;  %v5451_v63 = vpop.permute.xlu1 %4076  ;;  %v4069_v38 = vunpack.i.h.bf16 %v5428_v27  ;;  %v4068_v44 = vunpack.i.l.bf16 %v5428_v27  ;;  %v2737_v23 = vsel %vm2733_vm5, %v2704_v43, %v3814_v12  ;;  %v4028_v11 = vunpack.i.l.bf16 %v5367_v35  ;;  %p4363_p2 = pnand %p4362_p1, %p4356_p12 }
 0x23e   : > { %v4029_v2 = vunpack.i.h.bf16 %v5367_v35  ;;  %v2788_v41 = vsel %vm2766_vm4, %v2755_v36, %v4024_v18  ;;  %v2770_v32 = vsel %vm2766_vm4, %v2737_v23, %v4023_v45  ;;  %v4074_v18 = vunpack.i.h.bf16 %v5441_v37 }
 0x23f   : > { %v2802_v20 = vsel %vm2799_vm6, %v2769_v60, %v4068_v44  ;;  %v2820_v56 = vsel %vm2799_vm6, %v2787_v39, %v4069_v38  ;;  %v2803_v24 = vsel %vm2799_vm6, %v2770_v32, %v4028_v11  ;;  %v4073_v49 = vunpack.i.l.bf16 %v5441_v37  ;;  %v1744_v60 = vld [vmem:[#allocation2 + $0x62] sm:$0xff]  ;;  %v1762_v38 = vld [vmem:[#allocation2 + $0x13a] sm:$0xff] }
 0x240   : > { %v2821_v43 = vsel %vm2799_vm6, %v2788_v41, %v4029_v2  ;;  %v3803_v37 = vunpack.i.l.bf16 %v5150_v25  ;;  %v3808_v44 = vunpack.i.l.bf16 %v5154_v31  ;;  %v3804_v11 = vunpack.i.h.bf16 %v5150_v25 }
 0x241   : > { %v5463_v58 = vpop.permute.xlu1 %4096  ;;  %v5465_v5 = vpop.permute.xlu0 %4086  ;;  %v3828_v2 = vunpack.i.l.bf16 %v5161_v29  ;;  %v3809_v32 = vunpack.i.h.bf16 %v5154_v31 }
 0x245   : > { %v4102_v47 = vpop.permute.xlu1 %4101  ;;  %v5481_v40 = vpop.permute.xlu0 %4091 }
 0x246   : > { %v4104_v3 = vunpack.i.h.bf16 %v4102_v47  ;;  %v4103_v55 = vunpack.i.l.bf16 %v4102_v47 }
 0x248   : > { %v2835_v28 = vsel %vm2832_vm7, %v2802_v20, %v4103_v55  ;;  %v2853_v21 = vsel %vm2832_vm7, %v2820_v56, %v4104_v3  ;;  %v4033_v3 = vunpack.i.l.bf16 %v5369_v19  ;;  %v4098_v20 = vunpack.i.l.bf16 %v5463_v58  ;;  %v4325_v56 = vld [vmem:[#allocation2 + $0x30] sm:$0xff] }
 0x249   : > { %v4112_v22 = vpop.permute.xlu1 %4111  ;;  %v4107_v9 = vpop.permute.xlu0 %4106  ;;  %v2672_v41 = vsel %vm1394_vm1, %v4325_v56, %v3803_v37 }
 0x24a   : > { %v4114_v26 = vunpack.i.h.bf16 %v4112_v22  ;;  %v4113_v15 = vunpack.i.l.bf16 %v4112_v22  ;;  %v4109_v51 = vunpack.i.h.bf16 %v4107_v9  ;;  %v4108_v27 = vunpack.i.l.bf16 %v4107_v9 }
 0x24b   : > { %v4038_v22 = vunpack.i.l.bf16 %v5392_v4  ;;  %v4034_v9 = vunpack.i.h.bf16 %v5369_v19  ;;  %v2705_v25 = vsel %vm2700_vm3, %v2672_v41, %v3808_v44 }
 0x24c   : > { %v2868_v35 = vsel %vm2865_vm8, %v2835_v28, %v4108_v27  ;;  %v2886_v14 = vsel %vm2865_vm8, %v2853_v21, %v4109_v51  ;;  %v2836_v6 = vsel %vm2832_vm7, %v2803_v24, %v4113_v15  ;;  %v2854_v13 = vsel %vm2832_vm7, %v2821_v43, %v4114_v26  ;;  %v1505_v26 = vld [vmem:[#allocation2 + $0x108] sm:$0xff] }
 0x24d   : > { %v4117_v12 = vpop.permute.xlu1 %4116  ;;  %v5502_v61 = vpop.permute.xlu0 %4121  ;;  %3087 = vmatmul.mubr.f32.gmra.mxu0 %v2868_v35  ;;  %3177 = vmatmul.mubr.f32.gmra.mxu1 %v2886_v14  ;;  %v2869_v47 = vsel %vm2865_vm8, %v2836_v6, %v4073_v49  ;;  %v2887_v45 = vsel %vm2865_vm8, %v2854_v13, %v4074_v18  ;;  %v4039_v15 = vunpack.i.h.bf16 %v5392_v4  ;;  %v2690_v28 = vsel %vm1394_vm1, %v1505_v26, %v4033_v3  ;;  %v4326_v14 = vld [vmem:[#allocation2 + $0x38] sm:$0xff] }
 0x24e   : > { %3492 = vmatprep.mubr.msk.f32.mxu0 %vm1394_vm1, %v1743_v34  ;;  %3510 = vmatprep.mubr.msk.f32.mxu1 %vm1394_vm1, %v1761_v59  ;;  %v4119_v51 = vunpack.i.h.bf16 %v4117_v12  ;;  %v4118_v27 = vunpack.i.l.bf16 %v4117_v12  ;;  %v4099_v21 = vunpack.i.h.bf16 %v5463_v58  ;;  %v2673_v24 = vsel %vm1394_vm1, %v4326_v14, %v3804_v11  ;;  %v1506_v12 = vld [vmem:[#allocation2 + $0x110] sm:$0xff] }
 0x24f   : > { %v3829_v43 = vunpack.i.h.bf16 %v5161_v29  ;;  %v2738_v4 = vsel %vm2733_vm5, %v2705_v25, %v3828_v2  ;;  %v2723_v31 = vsel %vm2700_vm3, %v2690_v28, %v4038_v22  ;;  %v2691_v34 = vsel %vm1394_vm1, %v1506_v12, %v4034_v9  ;;  %v1745_v14 = vld [vmem:[#allocation2 + $0x6a] sm:$0xff] }
 0x250   : > { %v2756_v59 = vsel %vm2733_vm5, %v2723_v31, %v4098_v20  ;;  %v4124_v58 = vunpack.i.h.bf16 %v5502_v61  ;;  %v4123_v6 = vunpack.i.l.bf16 %v5502_v61  ;;  %v2724_v13 = vsel %vm2700_vm3, %v2691_v34, %v4039_v15 }
 0x251   : > { %v5512_v36 = vpop.permute.xlu1 %4131  ;;  %v5514_v39 = vpop.permute.xlu0 %4126  ;;  %3092 = vmatmul.mubr.f32.gmra.mxu0 %v2869_v47  ;;  %3182 = vmatmul.mubr.f32.gmra.mxu1 %v2887_v45  ;;  %v4078_v18 = vunpack.i.l.bf16 %v5451_v63  ;;  %v2771_v49 = vsel %vm2766_vm4, %v2738_v4, %v4118_v27  ;;  %v2789_v29 = vsel %vm2766_vm4, %v2756_v59, %v4119_v51  ;;  %v2706_v47 = vsel %vm2700_vm3, %v2673_v24, %v3809_v32  ;;  %v1763_v24 = vld [vmem:[#allocation2 + $0x142] sm:$0xff] }
 0x252   : > { %3493 = vmatprep.mubr.msk.f32.mxu0 %vm1394_vm1, %v1744_v60  ;;  %3511 = vmatprep.mubr.msk.f32.mxu1 %vm1394_vm1, %v1762_v38  ;;  %v4079_v45 = vunpack.i.h.bf16 %v5451_v63  ;;  %v2757_v60 = vsel %vm2733_vm5, %v2724_v13, %v4099_v21  ;;  %v2739_v2 = vsel %vm2733_vm5, %v2706_v47, %v3829_v43  ;;  %v4083_v22 = vunpack.i.l.bf16 %v5449_v54 }
 0x253   : > { %v2804_v9 = vsel %vm2799_vm6, %v2771_v49, %v4123_v6  ;;  %v2822_v20 = vsel %vm2799_vm6, %v2789_v29, %v4124_v58  ;;  %v2772_v56 = vsel %vm2766_vm4, %v2739_v2, %v4078_v18  ;;  %v4084_v15 = vunpack.i.h.bf16 %v5449_v54 }
 0x254   : > { %v2790_v26 = vsel %vm2766_vm4, %v2757_v60, %v4079_v45  ;;  %v4129_v43 = vunpack.i.h.bf16 %v5514_v39  ;;  %v4128_v4 = vunpack.i.l.bf16 %v5514_v39  ;;  %v2805_v54 = vsel %vm2799_vm6, %v2772_v56, %v4083_v22 }
 0x255   : > { %v5521_v55 = vpop.permute.xlu1 %4141  ;;  %v5523_v23 = vpop.permute.xlu0 %4136  ;;  %v2823_v12 = vsel %vm2799_vm6, %v2790_v26, %v4084_v15  ;;  %v3818_v39 = vunpack.i.l.bf16 %v5163_v7  ;;  %v4088_v18 = vunpack.i.l.bf16 %v5465_v5  ;;  %v3823_v47 = vunpack.i.l.bf16 %v5169_v42 }
 0x256   : > { %v4093_v45 = vunpack.i.l.bf16 %v5481_v40  ;;  %v3843_v60 = vunpack.i.l.bf16 %v5176_v0  ;;  %v3824_v56 = vunpack.i.h.bf16 %v5169_v42  ;;  %v3844_v26 = vunpack.i.h.bf16 %v5176_v0 }
 0x259   : > { %v5536_v35 = vpop.permute.xlu1 %4146  ;;  %v5538_v19 = vpop.permute.xlu0 %4151 }
 0x25a   : > { %v4154_v22 = vunpack.i.h.bf16 %v5538_v19 }
 0x25d   : > { %v4157_v38 = vpop.permute.xlu1 %4156  ;;  %v4162_v37 = vpop.permute.xlu0 %4161 }
 0x25e   : > { %v4159_v44 = vunpack.i.h.bf16 %v4157_v38  ;;  %v4158_v3 = vunpack.i.l.bf16 %v4157_v38  ;;  %v4164_v11 = vunpack.i.h.bf16 %v4162_v37  ;;  %v4163_v61 = vunpack.i.l.bf16 %v4162_v37  ;;  %v1507_v37 = vld [vmem:[#allocation2 + $0x120] sm:$0xff] }
 0x25f   : > { %v4089_v38 = vunpack.i.h.bf16 %v5465_v5  ;;  %v2692_v2 = vsel %vm1394_vm1, %v1507_v37, %v4088_v18  ;;  %v3819_v5 = vunpack.i.h.bf16 %v5163_v7 }
 0x260   : > { %v2837_v63 = vsel %vm2832_vm7, %v2804_v9, %v4158_v3  ;;  %v2855_v41 = vsel %vm2832_vm7, %v2822_v20, %v4159_v44 }
 0x261   : > { %v4167_v51 = vpop.permute.xlu1 %4166  ;;  %v5564_v27 = vpop.permute.xlu0 %4176  ;;  %v2870_v32 = vsel %vm2865_vm8, %v2837_v63, %v4163_v61  ;;  %v2888_v25 = vsel %vm2865_vm8, %v2855_v41, %v4164_v11  ;;  %v4327_v11 = vld [vmem:[#allocation2 + $0x48] sm:$0xff]  ;;  %v2725_v41 = vsel %vm2700_vm3, %v2692_v2, %v4093_v45  ;;  %v1765_v2 = vld [vmem:[#allocation2 + $0x15a] sm:$0xff] }
 0x262   : > { %v4169_v28 = vunpack.i.h.bf16 %v4167_v51  ;;  %v4168_v21 = vunpack.i.l.bf16 %v4167_v51  ;;  %3097 = vmatmul.mubr.f32.gmra.mxu0 %v2870_v32  ;;  %3187 = vmatmul.mubr.f32.gmra.mxu1 %v2888_v25  ;;  %v2674_v61 = vsel %vm1394_vm1, %v4327_v11, %v3818_v39  ;;  %v4134_v25 = vunpack.i.h.bf16 %v5512_v36 }
 0x263   : > { %3494 = vmatprep.mubr.msk.f32.mxu0 %vm1394_vm1, %v1745_v14  ;;  %3512 = vmatprep.mubr.msk.f32.mxu1 %vm1394_vm1, %v1763_v24  ;;  %v2707_v63 = vsel %vm2700_vm3, %v2674_v61, %v3823_v47  ;;  %v4179_v0 = vunpack.i.h.bf16 %v5564_v27  ;;  %v4178_v14 = vunpack.i.l.bf16 %v5564_v27  ;;  %v1747_v61 = vld [vmem:[#allocation2 + $0x82] sm:$0xff] }
 0x264   : > { %v2838_v31 = vsel %vm2832_vm7, %v2805_v54, %v4168_v21  ;;  %v2856_v34 = vsel %vm2832_vm7, %v2823_v12, %v4169_v28  ;;  %v2740_v15 = vsel %vm2733_vm5, %v2707_v63, %v3843_v60  ;;  %v4133_v28 = vunpack.i.l.bf16 %v5512_v36 }
 0x265   : > { %v4172_v59 = vpop.permute.xlu1 %4171  ;;  %v5576_v58 = vpop.permute.xlu0 %4186  ;;  %v2871_v6 = vsel %vm2865_vm8, %v2838_v31, %v4128_v4  ;;  %v2889_v13 = vsel %vm2865_vm8, %v2856_v34, %v4129_v43  ;;  %v4328_v34 = vld [vmem:[#allocation2 + $0x50] sm:$0xff]  ;;  %v4139_v60 = vunpack.i.h.bf16 %v5523_v23 }
 0x266   : > { %3102 = vmatmul.mubr.f32.gmra.mxu0 %v2871_v6  ;;  %3192 = vmatmul.mubr.f32.gmra.mxu1 %v2889_v13  ;;  %v4174_v44 = vunpack.i.h.bf16 %v4172_v59  ;;  %v4173_v3 = vunpack.i.l.bf16 %v4172_v59  ;;  %v2675_v59 = vsel %vm1394_vm1, %v4328_v34, %v3819_v5  ;;  %v4138_v6 = vunpack.i.l.bf16 %v5523_v23  ;;  %v1509_v34 = vld [vmem:[#allocation2 + $0x138] sm:$0xff] }
 0x267   : > { %3495 = vmatprep.mubr.msk.f32.mxu0 %vm1394_vm1, %v5251_v57  ;;  %3513 = vmatprep.mubr.msk.f32.mxu1 %vm1394_vm1, %v5215_v50  ;;  %v4153_v57 = vunpack.i.l.bf16 %v5538_v19  ;;  %v4094_v50 = vunpack.i.h.bf16 %v5481_v40  ;;  %v1508_v40 = vld [vmem:[#allocation2 + $0x128] sm:$0xff]  ;;  %v2708_v39 = vsel %vm2700_vm3, %v2675_v59, %v3824_v56  ;;  %v1510_v59 = vld [vmem:[#allocation2 + $0x140] sm:$0xff] }
 0x268   : > { %v2693_v51 = vsel %vm1394_vm1, %v1508_v40, %v4089_v38  ;;  %v2773_v7 = vsel %vm2766_vm4, %v2740_v15, %v4173_v3  ;;  %v2741_v45 = vsel %vm2733_vm5, %v2708_v39, %v3844_v26 }
 0x269   : > { %v5586_v49 = vpop.permute.xlu1 %4181  ;;  %v5588_v29 = vpop.permute.xlu0 %4196  ;;  %v2758_v19 = vsel %vm2733_vm5, %v2725_v41, %v4153_v57  ;;  %v2726_v32 = vsel %vm2700_vm3, %v2693_v51, %v4094_v50  ;;  %v2806_v13 = vsel %vm2799_vm6, %v2773_v7, %v4178_v14  ;;  %v2774_v50 = vsel %vm2766_vm4, %v2741_v45, %v4133_v28 }
 0x26a   : > { %v2791_v42 = vsel %vm2766_vm4, %v2758_v19, %v4174_v44  ;;  %v2759_v21 = vsel %vm2733_vm5, %v2726_v32, %v4154_v22  ;;  %v4184_v22 = vunpack.i.h.bf16 %v5586_v49  ;;  %v4183_v5 = vunpack.i.l.bf16 %v5586_v49 }
 0x26b   : > { %v2824_v36 = vsel %vm2799_vm6, %v2791_v42, %v4179_v0  ;;  %v2792_v47 = vsel %vm2766_vm4, %v2759_v21, %v4134_v25  ;;  %v2807_v23 = vsel %vm2799_vm6, %v2774_v50, %v4138_v6  ;;  %v3834_v19 = vunpack.i.h.bf16 %v5171_v16 }
 0x26c   : > { %v2825_v56 = vsel %vm2799_vm6, %v2792_v47, %v4139_v60  ;;  %v3833_v32 = vunpack.i.l.bf16 %v5171_v16  ;;  %v3839_v7 = vunpack.i.h.bf16 %v5178_v17  ;;  %v3838_v42 = vunpack.i.l.bf16 %v5178_v17 }
 0x26d   : > { %v5599_v9 = vpop.permute.xlu1 %4191  ;;  %v5601_v20 = vpop.permute.xlu0 %4201  ;;  %v3858_v28 = vunpack.i.l.bf16 %v5183_v52  ;;  %v4144_v21 = vunpack.i.h.bf16 %v5521_v55  ;;  %v4148_v0 = vunpack.i.l.bf16 %v5536_v35  ;;  %v4189_v45 = vunpack.i.h.bf16 %v5576_v58 }
 0x26e   : > { %v4188_v60 = vunpack.i.l.bf16 %v5576_v58  ;;  %v4193_v58 = vunpack.i.l.bf16 %v5599_v9 }
 0x26f   : > { %v2695_v39 = vsel %vm1394_vm1, %v1510_v59, %v4144_v21  ;;  %v4198_v59 = vunpack.i.l.bf16 %v5588_v29 }
 0x271   : > { %v4207_v24 = vpop.permute.xlu1 %4206  ;;  %v4212_v43 = vpop.permute.xlu0 %4211 }
 0x272   : > { %v4209_v4 = vunpack.i.h.bf16 %v4207_v24  ;;  %v4208_v54 = vunpack.i.l.bf16 %v4207_v24  ;;  %v4214_v12 = vunpack.i.h.bf16 %v4212_v43  ;;  %v4213_v31 = vunpack.i.l.bf16 %v4212_v43  ;;  %v4329_v24 = vld [vmem:[#allocation2 + $0x60] sm:$0xff]  ;;  %v4330_v43 = vld [vmem:[#allocation2 + $0x68] sm:$0xff] }
 0x273   : > { %v2676_v16 = vsel %vm1394_vm1, %v4329_v24, %v3833_v32 }
 0x274   : > { %v2839_v18 = vsel %vm2832_vm7, %v2806_v13, %v4208_v54  ;;  %v2857_v27 = vsel %vm2832_vm7, %v2824_v36, %v4209_v4  ;;  %v2677_v4 = vsel %vm1394_vm1, %v4330_v43, %v3834_v19  ;;  %v3859_v13 = vunpack.i.h.bf16 %v5183_v52 }
 0x275   : > { %v4217_v38 = vpop.permute.xlu1 %4216  ;;  %v2872_v57 = vsel %vm2865_vm8, %v2839_v18, %v4213_v31  ;;  %v2890_v37 = vsel %vm2865_vm8, %v2857_v27, %v4214_v12  ;;  %v2709_v31 = vsel %vm2700_vm3, %v2676_v16, %v3838_v42 }
 0x276   : > { %v4219_v44 = vunpack.i.h.bf16 %v4217_v38  ;;  %v4218_v3 = vunpack.i.l.bf16 %v4217_v38  ;;  %v4222_v11 = vpop.permute.xlu0 %4221  ;;  %3107 = vmatmul.mubr.f32.gmra.mxu0 %v2872_v57  ;;  %3197 = vmatmul.mubr.f32.gmra.mxu1 %v2890_v37  ;;  %v2742_v36 = vsel %vm2733_vm5, %v2709_v31, %v3858_v28 }
 0x277   : > { %3496 = vmatprep.mubr.msk.f32.mxu0 %vm1394_vm1, %v1747_v61  ;;  %3514 = vmatprep.mubr.msk.f32.mxu1 %vm1394_vm1, %v1765_v2  ;;  %v4224_v54 = vunpack.i.h.bf16 %v4222_v11  ;;  %v4223_v17 = vunpack.i.l.bf16 %v4222_v11 }
 0x278   : > { %v2840_v63 = vsel %vm2832_vm7, %v2807_v23, %v4218_v3  ;;  %v2858_v40 = vsel %vm2832_vm7, %v2825_v56, %v4219_v44  ;;  %v4194_v23 = vunpack.i.h.bf16 %v5599_v9 }
 0x279   : > { %v5640_v41 = vpop.permute.xlu1 %4231  ;;  %v2873_v26 = vsel %vm2865_vm8, %v2840_v63, %v4183_v5  ;;  %v2891_v15 = vsel %vm2865_vm8, %v2858_v40, %v4184_v22 }
 0x27a   : > { %v4227_v51 = vpop.permute.xlu0 %4226  ;;  %3112 = vmatmul.mubr.f32.gmra.mxu0 %v2873_v26  ;;  %3202 = vmatmul.mubr.f32.gmra.mxu1 %v2891_v15  ;;  %v4234_v37 = vunpack.i.h.bf16 %v5640_v41  ;;  %v4233_v50 = vunpack.i.l.bf16 %v5640_v41 }
 0x27b   : > { %3497 = vmatprep.mubr.msk.f32.mxu0 %vm1394_vm1, %v5326_v30  ;;  %3515 = vmatprep.mubr.msk.f32.mxu1 %vm1394_vm1, %v5291_v62  ;;  %v4143_v30 = vunpack.i.l.bf16 %v5521_v55  ;;  %v4149_v62 = vunpack.i.h.bf16 %v5536_v35  ;;  %v2710_v55 = vsel %vm2700_vm3, %v2677_v4, %v3839_v7  ;;  %v4229_v6 = vunpack.i.h.bf16 %v4227_v51 }
 0x27c   : > { %v4228_v35 = vunpack.i.l.bf16 %v4227_v51  ;;  %v2743_v22 = vsel %vm2733_vm5, %v2710_v55, %v3859_v13  ;;  %v3849_v55 = vunpack.i.h.bf16 %v5185_v33  ;;  %v4199_v13 = vunpack.i.h.bf16 %v5588_v29  ;;  %v4332_v29 = vld [vmem:[#allocation2 + $0x78] sm:$0xff] }
 0x27d   : > { %v5648_v49 = vpop.permute.xlu1 %4241  ;;  %v2694_v18 = vsel %vm1394_vm1, %v1509_v34, %v4143_v30  ;;  %v2728_v47 = vsel %vm2700_vm3, %v2695_v39, %v4149_v62  ;;  %v2776_v5 = vsel %vm2766_vm4, %v2743_v22, %v4188_v60  ;;  %v3848_v34 = vunpack.i.l.bf16 %v5185_v33 }
 0x27e   : > { %v5652_v25 = vpop.permute.xlu0 %4236  ;;  %v2727_v27 = vsel %vm2700_vm3, %v2694_v18, %v4148_v0  ;;  %v2761_v57 = vsel %vm2733_vm5, %v2728_v47, %v4224_v54  ;;  %v2775_v3 = vsel %vm2766_vm4, %v2742_v36, %v4228_v35  ;;  %v2809_v21 = vsel %vm2799_vm6, %v2776_v5, %v4193_v58  ;;  %v4331_v54 = vld [vmem:[#allocation2 + $0x172] sm:$0xff] }
 0x27f   : > { %v2760_v52 = vsel %vm2733_vm5, %v2727_v27, %v4223_v17  ;;  %v2794_v63 = vsel %vm2766_vm4, %v2761_v57, %v4189_v45  ;;  %v2808_v15 = vsel %vm2799_vm6, %v2775_v3, %v4233_v50  ;;  %v4239_v16 = vunpack.i.h.bf16 %v5652_v25  ;;  %v4334_v50 = vld [vmem:[#allocation2 + $0x150] sm:$0xff] }
 0x280   : > { %v2793_v11 = vsel %vm2766_vm4, %v2760_v52, %v4229_v6  ;;  %v2827_v30 = vsel %vm2799_vm6, %v2794_v63, %v4194_v23  ;;  %v4238_v43 = vunpack.i.l.bf16 %v5652_v25  ;;  %v1750_v25 = vld [vmem:[#allocation2 + $0xaa] sm:$0xff]  ;;  %v3854_v35 = vunpack.i.h.bf16 %v5190_v46  ;;  %v4333_v52 = vld [vmem:[#allocation2 + $0x80] sm:$0xff] }
 0x281   : > { %v5661_v14 = vpop.permute.xlu1 %4251  ;;  %v2826_v51 = vsel %vm2799_vm6, %v2793_v11, %v4234_v37  ;;  %v4203_v36 = vunpack.i.l.bf16 %v5601_v20  ;;  %v3874_v33 = vunpack.i.h.bf16 %v5194_v10  ;;  %v3873_v18 = vunpack.i.l.bf16 %v5194_v10  ;;  %v4335_v11 = vld [vmem:[#allocation2 + $0x158] sm:$0xff] }
 0x282   : > { %v5665_v12 = vpop.permute.xlu0 %4246  ;;  %v4204_v27 = vunpack.i.h.bf16 %v5601_v20  ;;  %v4243_v45 = vunpack.i.l.bf16 %v5648_v49  ;;  %v2678_v57 = vsel %vm1394_vm1, %v4332_v29, %v3848_v34  ;;  %v2679_v37 = vsel %vm1394_vm1, %v4333_v52, %v3849_v55 }
 0x283   : > { %v2712_v20 = vsel %vm2700_vm3, %v2679_v37, %v3854_v35  ;;  %v4244_v63 = vunpack.i.h.bf16 %v5648_v49 }
 0x284   : > { %v2745_v58 = vsel %vm2733_vm5, %v2712_v20, %v3874_v33 }
 0x285   : > { %v5677_v38 = vpop.permute.xlu1 %4256 }
 0x286   : > { %v4262_v44 = vpop.permute.xlu0 %4261  ;;  %v4259_v29 = vunpack.i.h.bf16 %v5677_v38 }
 0x287   : > { %v4264_v61 = vunpack.i.h.bf16 %v4262_v44  ;;  %v4263_v2 = vunpack.i.l.bf16 %v4262_v44 }
 0x289   : > { %v4267_v56 = vpop.permute.xlu1 %4266  ;;  %v2841_v7 = vsel %vm2832_vm7, %v2808_v15, %v4263_v2  ;;  %v2859_v42 = vsel %vm2832_vm7, %v2826_v51, %v4264_v61  ;;  %v2697_v61 = vsel %vm1394_vm1, %v4335_v11, %v4199_v13  ;;  %v4253_v15 = vunpack.i.l.bf16 %v5661_v14  ;;  %v1751_v13 = vld [vmem:[#allocation2 + $0xb2] sm:$0xff] }
 0x28a   : > { %v4272_v40 = vpop.permute.xlu0 %4271  ;;  %v4269_v41 = vunpack.i.h.bf16 %v4267_v56  ;;  %v4268_v26 = vunpack.i.l.bf16 %v4267_v56  ;;  %v2730_v23 = vsel %vm2700_vm3, %v2697_v61, %v4204_v27  ;;  %v4254_v27 = vunpack.i.h.bf16 %v5661_v14  ;;  %v1771_v61 = vld [vmem:[#allocation2 + $0x1a2] sm:$0xff] }
 0x28b   : > { %v4274_v19 = vunpack.i.h.bf16 %v4272_v40  ;;  %v4273_v32 = vunpack.i.l.bf16 %v4272_v40  ;;  %v2778_v40 = vsel %vm2766_vm4, %v2745_v58, %v4243_v45 }
 0x28c   : > { %v2874_v28 = vsel %vm2865_vm8, %v2841_v7, %v4268_v26  ;;  %v2892_v9 = vsel %vm2865_vm8, %v2859_v42, %v4269_v41  ;;  %v4248_v42 = vunpack.i.l.bf16 %v5665_v12 }
 0x28d   : > { %v4277_v62 = vpop.permute.xlu1 %4276  ;;  %3117 = vmatmul.mubr.f32.gmra.mxu0 %v2874_v28  ;;  %3207 = vmatmul.mubr.f32.gmra.mxu1 %v2892_v9  ;;  %v2842_v0 = vsel %vm2832_vm7, %v2809_v21, %v4273_v32  ;;  %v2860_v24 = vsel %vm2832_vm7, %v2827_v30, %v4274_v19  ;;  %v4258_v28 = vunpack.i.l.bf16 %v5677_v38 }
 0x28e   : > { %v5702_v4 = vpop.permute.xlu0 %4286  ;;  %3498 = vmatprep.mubr.msk.f32.mxu0 %vm1394_vm1, %v5287_v48  ;;  %3516 = vmatprep.mubr.msk.f32.mxu1 %vm1394_vm1, %v4331_v54  ;;  %v2875_v17 = vsel %vm2865_vm8, %v2842_v0, %v4238_v43  ;;  %v2893_v31 = vsel %vm2865_vm8, %v2860_v24, %v4239_v16  ;;  %v3853_v48 = vunpack.i.l.bf16 %v5190_v46  ;;  %v4278_v47 = vunpack.i.l.bf16 %v4277_v62 }
 0x28f   : > { %v4279_v44 = vunpack.i.h.bf16 %v4277_v62  ;;  %v4289_v51 = vunpack.i.h.bf16 %v5702_v4  ;;  %v4288_v19 = vunpack.i.l.bf16 %v5702_v4 }
 0x290   : > { %v2711_v10 = vsel %vm2700_vm3, %v2678_v57, %v3853_v48 }
 0x291   : > { %v4282_v6 = vpop.permute.xlu1 %4281  ;;  %3122 = vmatmul.mubr.f32.gmra.mxu0 %v2875_v17  ;;  %3212 = vmatmul.mubr.f32.gmra.mxu1 %v2893_v31  ;;  %v2744_v5 = vsel %vm2733_vm5, %v2711_v10, %v3873_v18  ;;  %v2763_v32 = vsel %vm2733_vm5, %v2730_v23, %v4279_v44  ;;  %v4249_v17 = vunpack.i.h.bf16 %v5665_v12  ;;  %v4337_v44 = vld [vmem:[#allocation2 + $0x170] sm:$0xff] }
 0x292   : > { %v4302_v39 = vpop.permute.xlu0 %4301  ;;  %3499 = vmatprep.mubr.msk.f32.mxu0 %vm1394_vm1, %v1750_v25  ;;  %3517 = vmatprep.mubr.msk.f32.mxu1 %vm1394_vm1, %v5398_v1  ;;  %v4284_v46 = vunpack.i.h.bf16 %v4282_v6  ;;  %v4283_v60 = vunpack.i.l.bf16 %v4282_v6  ;;  %v2696_v1 = vsel %vm1394_vm1, %v4334_v50, %v4198_v59  ;;  %v2796_v54 = vsel %vm2766_vm4, %v2763_v32, %v4244_v63  ;;  %v4336_v6 = vld [vmem:[#allocation2 + $0x168] sm:$0xff] }
 0x293   : > { %v2729_v2 = vsel %vm2700_vm3, %v2696_v1, %v4203_v36  ;;  %v4304_v30 = vunpack.i.h.bf16 %v4302_v39  ;;  %v4303_v62 = vunpack.i.l.bf16 %v4302_v39  ;;  %v2698_v25 = vsel %vm1394_vm1, %v4336_v6, %v4253_v15 }
 0x294   : > { %v2762_v56 = vsel %vm2733_vm5, %v2729_v2, %v4278_v47  ;;  %v2777_v41 = vsel %vm2766_vm4, %v2744_v5, %v4283_v60  ;;  %v2811_v36 = vsel %vm2799_vm6, %v2778_v40, %v4248_v42  ;;  %v2731_v39 = vsel %vm2700_vm3, %v2698_v25, %v4258_v28  ;;  %v1770_v60 = vld [vmem:[#allocation2 + $0x19a] sm:$0xff] }
 0x295   : > { %v5726_v3 = vpop.permute.xlu1 %4291  ;;  %v2795_v26 = vsel %vm2766_vm4, %v2762_v56, %v4284_v46  ;;  %v2810_v0 = vsel %vm2799_vm6, %v2777_v41, %v4288_v19  ;;  %v2829_v18 = vsel %vm2799_vm6, %v2796_v54, %v4249_v17 }
 0x296   : > { %v5732_v22 = vpop.permute.xlu0 %4311  ;;  %v2828_v24 = vsel %vm2799_vm6, %v2795_v26, %v4289_v51  ;;  %v4294_v12 = vunpack.i.h.bf16 %v5726_v3  ;;  %v4293_v33 = vunpack.i.l.bf16 %v5726_v3  ;;  %v2699_v3 = vsel %vm1394_vm1, %v4337_v44, %v4254_v27 }
 0x297   : > { %v4313_v16 = vunpack.i.l.bf16 %v5732_v22  ;;  %v4314_v50 = vunpack.i.h.bf16 %v5732_v22  ;;  %v2732_v38 = vsel %vm2700_vm3, %v2699_v3, %v4259_v29 }
 0x299   : > { %v4297_v7 = vpop.permute.xlu1 %4296  ;;  %v2764_v47 = vsel %vm2733_vm5, %v2731_v39, %v4313_v16  ;;  %v2765_v2 = vsel %vm2733_vm5, %v2732_v38, %v4314_v50 }
 0x29a   : > { %v4317_v49 = vpop.permute.xlu0 %4316  ;;  %v4299_v9 = vunpack.i.h.bf16 %v4297_v7  ;;  %v4298_v21 = vunpack.i.l.bf16 %v4297_v7 }
 0x29b   : > { %v4318_v31 = vunpack.i.l.bf16 %v4317_v49  ;;  %v4319_v1 = vunpack.i.h.bf16 %v4317_v49 }
 0x29c   : > { %v2843_v43 = vsel %vm2832_vm7, %v2810_v0, %v4298_v21  ;;  %v2861_v4 = vsel %vm2832_vm7, %v2828_v24, %v4299_v9 }
 0x29d   : > { %v4307_v55 = vpop.permute.xlu1 %4306  ;;  %v2876_v34 = vsel %vm2865_vm8, %v2843_v43, %v4303_v62  ;;  %v2894_v59 = vsel %vm2865_vm8, %v2861_v4, %v4304_v30  ;;  %v2797_v52 = vsel %vm2766_vm4, %v2764_v47, %v4318_v31  ;;  %v2798_v58 = vsel %vm2766_vm4, %v2765_v2, %v4319_v1 }
 0x29e   : > { %v4309_v35 = vunpack.i.h.bf16 %v4307_v55  ;;  %v4308_v48 = vunpack.i.l.bf16 %v4307_v55  ;;  %3127 = vmatmul.mubr.f32.gmra.mxu0 %v2876_v34  ;;  %3217 = vmatmul.mubr.f32.gmra.mxu1 %v2894_v59  ;;  %v2379_v10 = vpop.permute.xlu0 %2378 }
 0x29f   : > { %3500 = vmatprep.mubr.msk.f32.mxu0 %vm1394_vm1, %v1751_v13  ;;  %3518 = vmatprep.mubr.msk.f32.mxu1 %vm1394_vm1, %v5377_v8  ;;  %v2831_v23 = vsel %vm2799_vm6, %v2798_v58, %v2379_v10 }
 0x2a0   : > { %v2844_v45 = vsel %vm2832_vm7, %v2811_v36, %v4308_v48  ;;  %v2862_v46 = vsel %vm2832_vm7, %v2829_v18, %v4309_v35 }
 0x2a1   : > { %v2377_v57 = vpop.permute.xlu1 %2376  ;;  %v2877_v37 = vsel %vm2865_vm8, %v2844_v45, %v4293_v33  ;;  %v2895_v8 = vsel %vm2865_vm8, %v2862_v46, %v4294_v12 }
 0x2a2   : > { %v2830_v14 = vsel %vm2799_vm6, %v2797_v52, %v2377_v57  ;;  %3132 = vmatmul.mubr.f32.gmra.mxu0 %v2877_v37  ;;  %3222 = vmatmul.mubr.f32.gmra.mxu1 %v2895_v8  ;;  %v2635_v5 = vpop.permute.xlu0 %2634 }
 0x2a3   : > { %3519 = vmatprep.mubr.msk.f32.mxu1 %vm1394_vm1, %v1770_v60  ;;  %v2863_v11 = vsel %vm2832_vm7, %v2830_v14, %v5136_v53 }
 0x2a5   : > { %v2633_v20 = vpop.permute.xlu1 %2632 }
 0x2a6   : > { %v2896_v22 = vsel %vm2865_vm8, %v2863_v11, %v2633_v20 }
 0x2a7   : > { %3227 = vmatmul.mubr.f32.gmra.mxu1 %v2896_v22 }
 0x2a8   : > { %3520 = vmatprep.mubr.msk.f32.mxu1 %vm1394_vm1, %v1771_v61 }
 0x2aa   : > { %v2507_v56 = vpop.permute.xlu1 %2506 }
 0x2ab   : > { %v2864_v63 = vsel %vm2832_vm7, %v2831_v23, %v2507_v56 }
 0x2ac   : > { %v2897_v40 = vsel %vm2865_vm8, %v2864_v63, %v2635_v5 }
 0x2ad   : > { %3232 = vmatmul.mubr.f32.gmra.mxu1 %v2897_v40 }
 0x2c2   : > { %v5788_v53 = vpop.f32.mrf.mxu1 }
 0x2c4   : > { %v3140_v41 = vpop.f32.mrf.mxu1 }
 0x2c5   : > { %v3306_v41 = vpop.permute.xlu0 %3305 }
 0x2c6   : > { %v5790_v26 = vpop.f32.mrf.mxu1 }
 0x2c8   : > { %v3145_v15 = vpop.f32.mrf.mxu1 }
 0x2c9   : > { %v3311_v15 = vpop.permute.xlu0 %3310 }
 0x2d2   : > { %v5792_v51 = vpop.f32.mrf.mxu1 }
 0x2d4   : > { %v3150_v19 = vpop.f32.mrf.mxu1 }
 0x2d6   : > { %v5794_v32 = vpop.f32.mrf.mxu1 }
 0x2d8   : > { %v3155_v7 = vpop.f32.mrf.mxu1 }
 0x2e2   : > { %v3158_v42 = vpop.f32.mrf.mxu1 }
 0x2e3   : > { %3269 = vxpose.xlu0.b32.start [1/16] (narrow) %v3158_v42, 16 }
 0x2e4   : > { %v3160_v28 = vpop.f32.mrf.mxu1 }
 0x2e6   : > { %v3163_v49 = vpop.f32.mrf.mxu1 }
 0x2e7   : > { %3270 = vxpose.xlu0.b32.cont [2/16] (narrow) %v3163_v49, 16 }
 0x2e8   : > { %v3165_v9 = vpop.f32.mrf.mxu1 }
 0x2f6   : > { %v3078_v21 = vpop.f32.mrf.mxu0  ;;  %v3168_v30 = vpop.f32.mrf.mxu1 }
 0x2f7   : > { %3271 = vxpose.xlu0.b32.cont [3/16] (narrow) %v3168_v30, 16  ;;  %3237 = vxpose.xlu1.b32.start [1/16] (narrow) %v3078_v21, 16 }
 0x2f8   : > { %v3080_v62 = vpop.f32.mrf.mxu0  ;;  %v3170_v0 = vpop.f32.mrf.mxu1 }
 0x2fa   : > { %v3083_v24 = vpop.f32.mrf.mxu0  ;;  %v3173_v16 = vpop.f32.mrf.mxu1 }
 0x2fb   : > { %3272 = vxpose.xlu0.b32.cont [4/16] (narrow) %v3173_v16, 16  ;;  %3238 = vxpose.xlu1.b32.cont [2/16] (narrow) %v3083_v24, 16 }
 0x2fc   : > { %v3085_v43 = vpop.f32.mrf.mxu0  ;;  %v3175_v4 = vpop.f32.mrf.mxu1 }
 0x30d   : > { %v3088_v54 = vpop.f32.mrf.mxu0  ;;  %v3178_v17 = vpop.f32.mrf.mxu1 }
 0x30e   : > { %3273 = vxpose.xlu0.b32.cont [5/16] (narrow) %v3178_v17, 16  ;;  %3239 = vxpose.xlu1.b32.cont [3/16] (narrow) %v3088_v54, 16 }
 0x30f   : > { %v3090_v31 = vpop.f32.mrf.mxu0  ;;  %v3180_v55 = vpop.f32.mrf.mxu1 }
 0x311   : > { %v3093_v34 = vpop.f32.mrf.mxu0  ;;  %v3183_v59 = vpop.f32.mrf.mxu1 }
 0x312   : > { %3274 = vxpose.xlu0.b32.cont [6/16] (narrow) %v3183_v59, 16  ;;  %3240 = vxpose.xlu1.b32.cont [4/16] (narrow) %v3093_v34, 16 }
 0x313   : > { %v3095_v6 = vpop.f32.mrf.mxu0  ;;  %v3185_v25 = vpop.f32.mrf.mxu1 }
 0x322   : > { %v3098_v35 = vpop.f32.mrf.mxu0  ;;  %v3188_v48 = vpop.f32.mrf.mxu1 }
 0x323   : > { %3275 = vxpose.xlu0.b32.cont [7/16] (narrow) %v3188_v48, 16  ;;  %3241 = vxpose.xlu1.b32.cont [5/16] (narrow) %v3098_v35, 16 }
 0x324   : > { %v3100_v13 = vpop.f32.mrf.mxu0  ;;  %v3190_v36 = vpop.f32.mrf.mxu1 }
 0x326   : > { %v3103_v39 = vpop.f32.mrf.mxu0  ;;  %v3193_v12 = vpop.f32.mrf.mxu1 }
 0x327   : > { %3276 = vxpose.xlu0.b32.cont [8/16] (narrow) %v3193_v12, 16  ;;  %3242 = vxpose.xlu1.b32.cont [6/16] (narrow) %v3103_v39, 16 }
 0x328   : > { %v3105_v33 = vpop.f32.mrf.mxu0  ;;  %v3195_v18 = vpop.f32.mrf.mxu1 }
 0x336   : > { %v3108_v27 = vpop.f32.mrf.mxu0  ;;  %v3198_v47 = vpop.f32.mrf.mxu1 }
 0x337   : > { %3277 = vxpose.xlu0.b32.cont [9/16] (narrow) %v3198_v47, 16  ;;  %3243 = vxpose.xlu1.b32.cont [7/16] (narrow) %v3108_v27, 16 }
 0x338   : > { %v3110_v45 = vpop.f32.mrf.mxu0  ;;  %v3200_v46 = vpop.f32.mrf.mxu1 }
 0x33a   : > { %v3113_v60 = vpop.f32.mrf.mxu0  ;;  %v3203_v29 = vpop.f32.mrf.mxu1 }
 0x33b   : > { %3278 = vxpose.xlu0.b32.cont [10/16] (narrow) %v3203_v29, 16  ;;  %3244 = vxpose.xlu1.b32.cont [8/16] (narrow) %v3113_v60, 16 }
 0x33c   : > { %v3115_v57 = vpop.f32.mrf.mxu0  ;;  %v3205_v52 = vpop.f32.mrf.mxu1 }
 0x34d   : > { %v3118_v37 = vpop.f32.mrf.mxu0  ;;  %v3208_v8 = vpop.f32.mrf.mxu1 }
 0x34e   : > { %3279 = vxpose.xlu0.b32.cont [11/16] (narrow) %v3208_v8, 16  ;;  %3245 = vxpose.xlu1.b32.cont [9/16] (narrow) %v3118_v37, 16 }
 0x34f   : > { %v3120_v50 = vpop.f32.mrf.mxu0  ;;  %v3210_v14 = vpop.f32.mrf.mxu1 }
 0x351   : > { %v3123_v1 = vpop.f32.mrf.mxu0  ;;  %v3213_v44 = vpop.f32.mrf.mxu1 }
 0x352   : > { %3280 = vxpose.xlu0.b32.cont [12/16] (narrow) %v3213_v44, 16  ;;  %3246 = vxpose.xlu1.b32.cont [10/16] (narrow) %v3123_v1, 16 }
 0x353   : > { %v3125_v3 = vpop.f32.mrf.mxu0  ;;  %v3215_v38 = vpop.f32.mrf.mxu1 }
 0x35e   : > { %v3128_v10 = vpop.f32.mrf.mxu0  ;;  %v3218_v20 = vpop.f32.mrf.mxu1 }
 0x35f   : > { %3281 = vxpose.xlu0.b32.cont [13/16] (narrow) %v3218_v20, 16  ;;  %3247 = vxpose.xlu1.b32.cont [11/16] (narrow) %v3128_v10, 16 }
 0x360   : > { %v3130_v11 = vpop.f32.mrf.mxu0  ;;  %v3220_v61 = vpop.f32.mrf.mxu1 }
 0x362   : > { %v3133_v2 = vpop.f32.mrf.mxu0  ;;  %v3223_v22 = vpop.f32.mrf.mxu1 }
 0x363   : > { %3282 = vxpose.xlu0.b32.cont [14/16] (narrow) %v3223_v22, 16  ;;  %3248 = vxpose.xlu1.b32.cont [12/16] (narrow) %v3133_v2, 16 }
 0x364   : > { %v3135_v58 = vpop.f32.mrf.mxu0  ;;  %v3225_v5 = vpop.f32.mrf.mxu1 }
 0x367   : > { %3249 = vxpose.xlu1.b32.cont [13/16] (narrow) %v5788_v53, 16  ;;  %v3228_v23 = vpop.f32.mrf.mxu1 }
 0x368   : > { %3283 = vxpose.xlu0.b32.cont [15/16] (narrow) %v3228_v23, 16 }
 0x369   : > { %v3230_v56 = vpop.f32.mrf.mxu1 }
 0x36b   : > { %3250 = vxpose.xlu1.b32.cont [14/16] (narrow) %v5790_v26, 16 }
 0x36d   : > { %v3233_v63 = vpop.f32.mrf.mxu1 }
 0x36e   : > { %3284 = vxpose.xlu0.b32.end [16/16] (narrow) %v3233_v63, 16 }
 0x36f   : > { %v3235_v40 = vpop.f32.mrf.mxu1  ;;  %3251 = vxpose.xlu1.b32.cont [15/16] (narrow) %v5792_v51, 16 }
 0x373   : > { %3252 = vxpose.xlu1.b32.end [16/16] (narrow) %v5794_v32, 16 }
 0x3ae   : > { %v3285_v19 = vpop.trf.xlu0 }
 0x3af   : > { %v3314_v7 = vadd.f32 %v3306_v41, %v3285_v19 }
 0x3b1   : > { %v3318_v42 = vmax.f32 %v3314_v7, 0.0 }
 0x3b2   : > { %v3286_v53 = vpop.trf.xlu0 }
 0x3b3   : > { %v3322_v28 = vmin.f32 %v3318_v42, 6.0  ;;  %v3316_v49 = vadd.f32 %v3311_v15, %v3286_v53  ;;  %v3253_v9 = vpop.trf.xlu1 }
 0x3b4   : > { %v3313_v26 = vadd.f32 %v3306_v41, %v3253_v9 }
 0x3b5   : > { %3326 = vst [vmem:[%s300_s23 + $0x8] sm:$0xff] %v3322_v28  ;;  %v3320_v21 = vmax.f32 %v3316_v49, 0.0 }
 0x3b6   : > { %v3317_v30 = vmax.f32 %v3313_v26, 0.0 }
 0x3b7   : > { %v3324_v51 = vmin.f32 %v3320_v21, 6.0  ;;  %v3254_v32 = vpop.trf.xlu1 }
 0x3b8   : > { %v3321_v62 = vmin.f32 %v3317_v30, 6.0  ;;  %v3315_v0 = vadd.f32 %v3311_v15, %v3254_v32 }
 0x3b9   : > { %3328 = vst [vmem:[%s300_s23 + $0x18] sm:$0xff] %v3324_v51 }
 0x3ba   : > { %3325 = vst [vmem:[%s300_s23] sm:$0xff] %v3321_v62  ;;  %v3319_v24 = vmax.f32 %v3315_v0, 0.0 }
 0x3bc   : > { %v3323_v16 = vmin.f32 %v3319_v24, 6.0 }
 0x3be   : > { %3327 = vst [vmem:[%s300_s23 + $0x10] sm:$0xff] %v3323_v16 }
 0x3bf   : > { %4366 = shalt.err (!%p4363_p2)
}
 0x3c0   : > { %s4367_s9 = scalar_lea.hbm %s5807_s16, 512  ;;  %s4371_s23 = scalar_lea.hbm %s5857_s7, 1024 }
 0x3c1   : > { %p4368_p3 = scmp.ne.s32.totalorder %s5807_s16, %s4367_s9  ;;  %p4372_p8 = scmp.lt.s32.totalorder %s5807_s16, %s5857_s7 }
 0x3c2   : > { %p4373_p11 = scmp.lt.s32.totalorder %s4371_s23, %s4367_s9 }
 0x3c3   : > { %p4369_p4 = pnand %p4368_p3, %p4510_p5 }
 0x3c4   : > { %p4374_p9 = por %p4373_p11, %p4372_p8 }
 0x3c5   : > { %p4370_p7 = pneg %p4369_p4 }
 0x3c7   : > { %p4375_p10 = pnand %p4374_p9, %p4370_p7 }
 0x3c9   : > { %4378 = shalt.err (!%p4375_p10)
}
 0x3ca   : > { %s4431_s29 = smov 256  }
 0x3cb   : > { %3718 = dma.vmem_to_hbm [thread:$0]  (%p4510_p5), %s5802_s8, 512, %s5807_s16, %s5809_s20, %s4431_s29, %s4431_s29, %s4422_s13  }
 0x3cc PF: > { %p3730_p12 = scmp.ge.s32.totalorder %s4417_s27, 2  ;;  %s3358_s17 = sand.u32 1, %s4405_s24  }
 0x3cd   : > { %s3359_s28 = scalar_lea.sflag [#allocation4], %s3358_s17 }
 0x3ce   : > { %p3725_p13 = pnand %p3730_p12, %p4514_p6 }
 0x3d0   : > { %p3726_p0 = pneg %p3725_p13 }
 0x3d2   : > { %4400 = dma.done.wait (%p3726_p0), %s3359_s28, 512  }
 0x3d3   : > { %4402 = vsyncadd (%p3726_p0), %s3359_s28, 4294966784  ;;  %p18_p1 = scmp.ge.s32.totalorder %s4497_s30, 4   ;;  %s5861_s24 = smov %s4409_s25 }
 0x3d4   : > { %s5862_s25 = smov %s4413_s26  ;;  %s5863_s26 = smov %s4508_s10 }
 0x3d5   : > { %s5864_s27 = smov %s4497_s30  ;;  %20 = sbr.rel (!%p18_p1) target bundleno = 4 (0x4), region = 93 }
 0x3da   :  { %3364 = vsyncpa [#allocation4], 1 }
 0x3db   :  { %3366 = vsyncpa [#allocation4 + $0x1], 1 }
 0x3dc   :  { %3367 = vsyncpa [#allocation5], 1 }
 0x3dd   :  { %3369 = vsyncpa [#allocation5 + $0x1], 1 }

</bundles_post_ra>
